<compile_context>
chip_gen: v5e
topology: v5e:2x2
jax: 0.10.0
libtpu: 0.0.40
codegen_flags: <defaults>
</compile_context>

<pallas_src>
import math
import functools

import jax
import jax.numpy as jnp
from jax import lax
from jax.experimental import pallas as pl
from jax.experimental.pallas import tpu as pltpu

LN_EPS = 1e-5
_INV_SQRT2 = 0.7071067811865476


def _layernorm(x, gamma, beta):
    # x: (rows, D) f32, gamma/beta: (1, D) f32 -- stats kept in f32.
    mean = jnp.mean(x, axis=-1, keepdims=True)
    var = jnp.mean((x - mean) ** 2, axis=-1, keepdims=True)
    return (x - mean) * lax.rsqrt(var + LN_EPS) * gamma + beta


def _gelu_exact(x):
    # matches torch.nn.GELU() (erf formulation)
    return 0.5 * x * (1.0 + lax.erf(x * _INV_SQRT2))


def transformer_stack_kernel(
    x_ref,
    g1_ref, be1_ref,
    wqkv_ref, bqkv_ref, wo_ref, bo_ref,
    g2_ref, be2_ref,
    w1_ref, bm1_ref, w2_ref, bm2_ref,
    lnf_g_ref, lnf_b_ref,
    o_ref,
    *, n_heads,
):
    # grid = (batch_block, layer); activations for this batch block are carried
    # in the resident output block across the layer ("arbitrary") axis.
    layer = pl.program_id(1)
    last = pl.num_programs(1) - 1

    @pl.when(layer == 0)
    def _():
        o_ref[...] = x_ref[...]

    xb = o_ref[...]                                 # (bb, T, D) f32 residual stream
    bb, T, D = xb.shape
    dh = D // n_heads
    scale = 1.0 / math.sqrt(dh)
    x2d = xb.reshape(bb * T, D)                     # merge batch into rows (layout no-op)

    # ---- LayerNorm 1 (f32 stats) ----
    h = _layernorm(x2d, g1_ref[0], be1_ref[0])

    # ---- Fused QKV projection: one (bb*T, D) @ (D, 3D) bf16 MXU matmul ----
    qkv = jnp.dot(h.astype(jnp.bfloat16), wqkv_ref[0],
                  preferred_element_type=jnp.float32) + bqkv_ref[0]     # (bb*T, 3D) f32
    q = (qkv[:, 0 * D:1 * D] * scale).astype(jnp.bfloat16).reshape(bb, T, D)
    k = qkv[:, 1 * D:2 * D].astype(jnp.bfloat16).reshape(bb, T, D)
    v = qkv[:, 2 * D:3 * D].astype(jnp.bfloat16).reshape(bb, T, D)

    # causal mask: future tokens (upper triangle) disallowed
    row = lax.broadcasted_iota(jnp.int32, (T, T), 0)
    col = lax.broadcasted_iota(jnp.int32, (T, T), 1)
    disallow = col > row

    wo = wo_ref[0]                                   # (D, D) bf16

    # ---- Per-head attention (batched over bb): no head-axis transposes ----
    # TODO(synk): flash-style KV tiling (running max/sum/acc over KV blocks) for
    # long contexts; here scores are (bb, T, T) per head, fine for small T.
    attn_out = jnp.zeros((bb * T, D), jnp.float32)
    for hh in range(n_heads):
        cs = slice(hh * dh, (hh + 1) * dh)
        qh, kh, vh = q[:, :, cs], k[:, :, cs], v[:, :, cs]       # (bb, T, dh) bf16
        s = jnp.einsum('bqd,bkd->bqk', qh, kh,
                       preferred_element_type=jnp.float32)       # (bb, T, T) f32
        s = jnp.where(disallow, jnp.float32(-1e30), s)
        s = s - jnp.max(s, axis=-1, keepdims=True)
        p = jnp.exp(s)
        p = p * pl.reciprocal(jnp.sum(p, axis=-1, keepdims=True), approx=True)
        ctx = jnp.einsum('bqk,bkd->bqd', p.astype(jnp.bfloat16), vh,
                         preferred_element_type=jnp.float32)     # (bb, T, dh) f32
        # fold the output projection per head: ctx_h @ Wo[rows of head h]
        attn_out = attn_out + jnp.dot(
            ctx.reshape(bb * T, dh).astype(jnp.bfloat16), wo[cs, :],
            preferred_element_type=jnp.float32)
    attn_out = attn_out + bo_ref[0]

    x1 = x2d + attn_out                              # residual 1 (dropout = identity)

    # ---- LayerNorm 2 + MLP ----
    h2 = _layernorm(x1, g2_ref[0], be2_ref[0])
    m = jnp.dot(h2.astype(jnp.bfloat16), w1_ref[0],
                preferred_element_type=jnp.float32) + bm1_ref[0]
    m = _gelu_exact(m)
    m = jnp.dot(m.astype(jnp.bfloat16), w2_ref[0],
                preferred_element_type=jnp.float32) + bm2_ref[0]

    out2d = x1 + m                                   # residual 2 (dropout = identity)

    @pl.when(layer < last)
    def _():
        o_ref[...] = out2d.reshape(bb, T, D)

    # fold the model-final LayerNorm into the last layer step
    @pl.when(layer == last)
    def _():
        o_ref[...] = _layernorm(out2d, lnf_g_ref[...], lnf_b_ref[...]).reshape(bb, T, D)


def lm_head_kernel(x_ref, wout_ref, o_ref):
    # x already carries the final LayerNorm; pure bf16 matmul, f32 accumulate.
    o_ref[...] = jnp.dot(x_ref[...].astype(jnp.bfloat16), wout_ref[...],
                         preferred_element_type=jnp.float32)


def _pick_tile(n, max_tile, align):
    if n <= max_tile:
        return n
    start = max_tile - (max_tile % align)
    for t in range(start, align - 1, -align):
        if n % t == 0:
            return t
    return n


def _pick_batch_block(B, T, D, F, budget_bytes=6 * 1024 * 1024):
    best = 1
    for cand in range(1, B + 1):
        if B % cand:
            continue
        rows = cand * T
        # rough f32 live footprint per block: residual+out, qkv, mlp hidden, scores
        act = rows * (2 * D + 3 * D + F) * 4 + cand * T * T * 4 * 2
        if act <= budget_bytes:
            best = cand
    return best


def run_transformer_stack(x, layers, lnf_g, lnf_b, n_heads):
    B, T, D = x.shape
    L = layers['wqkv'].shape[0]
    F = layers['w1'].shape[-1]
    H = n_heads
    bb = _pick_batch_block(B, T, D, F)
    nb = B // bb

    x_spec = pl.BlockSpec((bb, T, D), lambda b, l: (b, 0, 0))

    def layer_spec(a):
        return pl.BlockSpec((1,) + a.shape[1:], lambda b, l: (l, 0, 0))

    const_spec = pl.BlockSpec((1, D), lambda b, l: (0, 0))

    order = ['g1', 'be1', 'wqkv', 'bqkv', 'wo', 'bo', 'g2', 'be2',
             'w1', 'bm1', 'w2', 'bm2']
    layer_arrays = [layers[k] for k in order]
    in_arrays = [x] + layer_arrays + [lnf_g, lnf_b]
    in_specs = [x_spec] + [layer_spec(a) for a in layer_arrays] + [const_spec, const_spec]

    # advisory cost estimate for XLA scheduling around the custom call
    flops = int(2 * B * T * L * (4 * D * D + 2 * T * D + 2 * D * F))
    trans = int(B * L * (H * T * T + T * F))
    weight_bytes = int(L * (3 * D * D + D * D + 2 * D * F) * 2)      # bf16 weights
    bytes_accessed = int(nb * weight_bytes + 2 * B * T * D * 4)
    cost = pl.CostEstimate(flops=flops, transcendentals=trans,
                           bytes_accessed=bytes_accessed)

    return pl.pallas_call(
        functools.partial(transformer_stack_kernel, n_heads=n_heads),
        out_shape=jax.ShapeDtypeStruct((B, T, D), jnp.float32),
        grid=(nb, L),
        in_specs=in_specs,
        out_specs=pl.BlockSpec((bb, T, D), lambda b, l: (b, 0, 0)),
        compiler_params=pltpu.CompilerParams(
            dimension_semantics=("parallel", "arbitrary"),
            vmem_limit_bytes=64 * 1024 * 1024),
        cost_estimate=cost,
    )(*in_arrays)


def run_lm_head(h, w_out):
    B, T, D = h.shape
    V = w_out.shape[1]
    BT = B * T
    h2 = h.reshape(BT, D)

    tile_v = _pick_tile(V, 2048, 128)
    tile_r = _pick_tile(BT, 512, 8)
    nr, nv = BT // tile_r, V // tile_v

    cost = pl.CostEstimate(
        flops=int(2 * BT * D * V), transcendentals=0,
        bytes_accessed=int(nr * D * V * 2 + BT * D * 4 + BT * V * 4))

    out = pl.pallas_call(
        lm_head_kernel,
        out_shape=jax.ShapeDtypeStruct((BT, V), jnp.float32),
        grid=(nr, nv),
        in_specs=[
            pl.BlockSpec((tile_r, D), lambda r, v: (r, 0)),
            pl.BlockSpec((D, tile_v), lambda r, v: (0, v)),
        ],
        out_specs=pl.BlockSpec((tile_r, tile_v), lambda r, v: (r, v)),
        compiler_params=pltpu.CompilerParams(
            dimension_semantics=("parallel", "parallel"),
            vmem_limit_bytes=64 * 1024 * 1024),
        cost_estimate=cost,
    )(h2, w_out)
    return out.reshape(B, T, V)


def init_params(key, vocab_size, context_length, emb_dim, ff_int_dim_mult, n_layers):
    D = emb_dim
    F = D * ff_int_dim_mult
    keys = iter(jax.random.split(key, 3 + 8 * n_layers))

    def nrm(k, shape, dtype, scale=0.02):
        return (scale * jax.random.normal(k, shape, dtype=jnp.float32)).astype(dtype)

    params = {
        'tok_emb': nrm(next(keys), (vocab_size, D), jnp.float32),
        'pos_emb': nrm(next(keys), (context_length, D), jnp.float32),
        'ln_g': jnp.ones((1, D), jnp.float32),
        'ln_b': jnp.zeros((1, D), jnp.float32),
        # weights that feed the MXU are stored bf16; biases / LN params stay f32
        'w_out': nrm(next(keys), (D, vocab_size), jnp.bfloat16),
    }
    wqkv, bqkv, wo, bo, w1, bm1, w2, bm2 = ([] for _ in range(8))
    for _ in range(n_layers):
        wqkv.append(nrm(next(keys), (D, 3 * D), jnp.bfloat16))   # fused q|k|v
        bqkv.append(nrm(next(keys), (1, 3 * D), jnp.float32))
        wo.append(nrm(next(keys), (D, D), jnp.bfloat16))
        bo.append(nrm(next(keys), (1, D), jnp.float32))
        w1.append(nrm(next(keys), (D, F), jnp.bfloat16))
        bm1.append(nrm(next(keys), (1, F), jnp.float32))
        w2.append(nrm(next(keys), (F, D), jnp.bfloat16))
        bm2.append(nrm(next(keys), (1, D), jnp.float32))
    params['layers'] = {
        'g1': jnp.ones((n_layers, 1, D), jnp.float32),
        'be1': jnp.zeros((n_layers, 1, D), jnp.float32),
        'wqkv': jnp.stack(wqkv), 'bqkv': jnp.stack(bqkv),
        'wo': jnp.stack(wo), 'bo': jnp.stack(bo),
        'g2': jnp.ones((n_layers, 1, D), jnp.float32),
        'be2': jnp.zeros((n_layers, 1, D), jnp.float32),
        'w1': jnp.stack(w1), 'bm1': jnp.stack(bm1),
        'w2': jnp.stack(w2), 'bm2': jnp.stack(bm2),
    }
    return params


def gpt_forward(tokens, params, n_heads):
    # tokens: (B, T) int32. Embedding gather + positional add as plain JAX glue.
    B, T = tokens.shape
    tok_emb = params['tok_emb'][tokens]                 # (B, T, D)
    pos_emb = params['pos_emb'][:T]                     # (T, D)
    x = (tok_emb + pos_emb[None]).astype(jnp.float32)   # dropout = identity
    # stack output already carries the final LayerNorm (fused at last layer)
    h = run_transformer_stack(x, params['layers'], params['ln_g'], params['ln_b'],
                              n_heads)
    return run_lm_head(h, params['w_out'])


if __name__ == "__main__":
    vocab_size = 64
    context_length = 8
    emb_dim = 32
    ff_int_dim_mult = 4
    n_heads = 4
    n_layers = 2
    batch = 2

    key = jax.random.PRNGKey(0)
    pkey, tkey = jax.random.split(key)
    params = init_params(pkey, vocab_size, context_length, emb_dim,
                         ff_int_dim_mult, n_layers)
    tokens = jax.random.randint(tkey, (batch, context_length), 0, vocab_size,
                                dtype=jnp.int32)

    logits = gpt_forward(tokens, params, n_heads)
    jax.block_until_ready(logits)
    assert logits.shape == (batch, context_length, vocab_size)
    print("KERNEL_OK")
</pallas_src>

<mosaic_0001>
module attributes {stable_mosaic.version = 11 : i64} {
  func.func @transformer_stack_kernel(%arg0: i32, %arg1: i32, %arg2: memref<2x8x32xf32, #tpu.memory_space<vmem>>, %arg3: memref<1x1x32xf32, #tpu.memory_space<vmem>>, %arg4: memref<1x1x32xf32, #tpu.memory_space<vmem>>, %arg5: memref<1x32x96xbf16, #tpu.memory_space<vmem>>, %arg6: memref<1x1x96xf32, #tpu.memory_space<vmem>>, %arg7: memref<1x32x32xbf16, #tpu.memory_space<vmem>>, %arg8: memref<1x1x32xf32, #tpu.memory_space<vmem>>, %arg9: memref<1x1x32xf32, #tpu.memory_space<vmem>>, %arg10: memref<1x1x32xf32, #tpu.memory_space<vmem>>, %arg11: memref<1x32x128xbf16, #tpu.memory_space<vmem>>, %arg12: memref<1x1x128xf32, #tpu.memory_space<vmem>>, %arg13: memref<1x128x32xbf16, #tpu.memory_space<vmem>>, %arg14: memref<1x1x32xf32, #tpu.memory_space<vmem>>, %arg15: memref<1x32xf32, #tpu.memory_space<vmem>>, %arg16: memref<1x32xf32, #tpu.memory_space<vmem>>, %arg17: memref<2x8x32xf32, #tpu.memory_space<vmem>>) attributes {dimension_semantics = [#tpu.dimension_semantics<parallel>, #tpu.dimension_semantics<arbitrary>], iteration_bounds = array<i64: 1, 2>, scalar_prefetch = 0 : i64, scratch_operands = 0 : i64, tpu.core_type = #tpu.core_type<tc>, window_params = [{transform_indices = @transform_0, window_bounds = array<i64: 2, 8, 32>}, {transform_indices = @transform_1, window_bounds = array<i64: 1, 1, 32>}, {transform_indices = @transform_2, window_bounds = array<i64: 1, 1, 32>}, {transform_indices = @transform_3, window_bounds = array<i64: 1, 32, 96>}, {transform_indices = @transform_4, window_bounds = array<i64: 1, 1, 96>}, {transform_indices = @transform_5, window_bounds = array<i64: 1, 32, 32>}, {transform_indices = @transform_6, window_bounds = array<i64: 1, 1, 32>}, {transform_indices = @transform_7, window_bounds = array<i64: 1, 1, 32>}, {transform_indices = @transform_8, window_bounds = array<i64: 1, 1, 32>}, {transform_indices = @transform_9, window_bounds = array<i64: 1, 32, 128>}, {transform_indices = @transform_10, window_bounds = array<i64: 1, 1, 128>}, {transform_indices = @transform_11, window_bounds = array<i64: 1, 128, 32>}, {transform_indices = @transform_12, window_bounds = array<i64: 1, 1, 32>}, {pipeline_mode = #tpu.pipeline_mode<synchronous>, transform_indices = @transform_13, window_bounds = array<i64: 1, 32>}, {pipeline_mode = #tpu.pipeline_mode<synchronous>, transform_indices = @transform_14, window_bounds = array<i64: 1, 32>}, {transform_indices = @transform_15, window_bounds = array<i64: 2, 8, 32>}]} {
    %c0_i32 = arith.constant 0 : i32
    %0 = arith.cmpi eq, %arg1, %c0_i32 : i32
    %1 = arith.extui %0 : i1 to i32
    %c0_i32_0 = arith.constant 0 : i32
    %2 = arith.cmpi ne, %1, %c0_i32_0 : i32
    scf.if %2 {
      %c0_83 = arith.constant 0 : index
      %c0_84 = arith.constant 0 : index
      %c0_85 = arith.constant 0 : index
      %218 = vector.load %arg2[%c0_83, %c0_84, %c0_85] : memref<2x8x32xf32, #tpu.memory_space<vmem>>, vector<2x8x32xf32>
      %c0_86 = arith.constant 0 : index
      %c0_87 = arith.constant 0 : index
      %c0_88 = arith.constant 0 : index
      %219 = vector.load %arg17[%c0_86, %c0_87, %c0_88] : memref<2x8x32xf32, #tpu.memory_space<vmem>>, vector<2x8x32xf32>
      tpu.vector_store %arg17[%c0_86, %c0_87, %c0_88], %218 {strides = array<i32>} : memref<2x8x32xf32, #tpu.memory_space<vmem>>, vector<2x8x32xf32>,
    } else {
    }
    %c0 = arith.constant 0 : index
    %c0_1 = arith.constant 0 : index
    %c0_2 = arith.constant 0 : index
    %3 = vector.load %arg17[%c0, %c0_1, %c0_2] : memref<2x8x32xf32, #tpu.memory_space<vmem>>, vector<2x8x32xf32>
    %4 = vector.shape_cast %3 : vector<2x8x32xf32> to vector<16x32xf32>
    %c0_3 = arith.constant 0 : index
    %c0_4 = arith.constant 0 : index
    %c0_5 = arith.constant 0 : index
    %5 = vector.load %arg3[%c0_3, %c0_4, %c0_5] : memref<1x1x32xf32, #tpu.memory_space<vmem>>, vector<1x1x32xf32>
    %6 = vector.shape_cast %5 : vector<1x1x32xf32> to vector<1x32xf32>
    %c0_6 = arith.constant 0 : index
    %c0_7 = arith.constant 0 : index
    %c0_8 = arith.constant 0 : index
    %7 = vector.load %arg4[%c0_6, %c0_7, %c0_8] : memref<1x1x32xf32, #tpu.memory_space<vmem>>, vector<1x1x32xf32>
    %8 = vector.shape_cast %7 : vector<1x1x32xf32> to vector<1x32xf32>
    %cst = arith.constant dense<0.000000e+00> : vector<16xf32>
    %9 = vector.multi_reduction <add>, %4, %cst [1] : vector<16x32xf32> to vector<16xf32>
    %10 = vector.shape_cast %9 : vector<16xf32> to vector<16x1xf32>
    %cst_9 = arith.constant 3.200000e+01 : f32
    %11 = vector.broadcast %cst_9 : f32 to vector<16x1xf32>
    %12 = arith.divf %10, %11 : vector<16x1xf32>
    %13 = vector.broadcast %12 : vector<16x1xf32> to vector<16x32xf32>
    %14 = arith.subf %4, %13 : vector<16x32xf32>
    %15 = arith.mulf %14, %14 : vector<16x32xf32>
    %cst_10 = arith.constant dense<0.000000e+00> : vector<16xf32>
    %16 = vector.multi_reduction <add>, %15, %cst_10 [1] : vector<16x32xf32> to vector<16xf32>
    %17 = vector.shape_cast %16 : vector<16xf32> to vector<16x1xf32>
    %cst_11 = arith.constant 3.200000e+01 : f32
    %18 = vector.broadcast %cst_11 : f32 to vector<16x1xf32>
    %19 = arith.divf %17, %18 : vector<16x1xf32>
    %20 = vector.broadcast %12 : vector<16x1xf32> to vector<16x32xf32>
    %21 = arith.subf %4, %20 : vector<16x32xf32>
    %cst_12 = arith.constant 9.99999974E-6 : f32
    %22 = vector.broadcast %cst_12 : f32 to vector<16x1xf32>
    %23 = arith.addf %19, %22 : vector<16x1xf32>
    %24 = math.rsqrt %23 : vector<16x1xf32>
    %25 = vector.broadcast %24 : vector<16x1xf32> to vector<16x32xf32>
    %26 = arith.mulf %21, %25 : vector<16x32xf32>
    %27 = vector.broadcast %6 : vector<1x32xf32> to vector<16x32xf32>
    %28 = arith.mulf %26, %27 : vector<16x32xf32>
    %29 = vector.broadcast %8 : vector<1x32xf32> to vector<16x32xf32>
    %30 = arith.addf %28, %29 : vector<16x32xf32>
    %31 = arith.truncf %30 : vector<16x32xf32> to vector<16x32xbf16>
    %c0_13 = arith.constant 0 : index
    %c0_14 = arith.constant 0 : index
    %c0_15 = arith.constant 0 : index
    %32 = vector.load %arg5[%c0_13, %c0_14, %c0_15] : memref<1x32x96xbf16, #tpu.memory_space<vmem>>, vector<1x32x96xbf16>
    %33 = vector.shape_cast %32 : vector<1x32x96xbf16> to vector<32x96xbf16>
    %cst_16 = arith.constant dense<0.000000e+00> : vector<16x96xf32>
    %34 = tpu.matmul %31, %33, %cst_16 {dimension_numbers = #tpu.dot_dimension_numbers<[1], [0], [0], [1], [0, 0, 1, 1], [], []>} : vector<16x32xbf16>, vector<32x96xbf16>, vector<16x96xf32> -> vector<16x96xf32>
    %c0_17 = arith.constant 0 : index
    %c0_18 = arith.constant 0 : index
    %c0_19 = arith.constant 0 : index
    %35 = vector.load %arg6[%c0_17, %c0_18, %c0_19] : memref<1x1x96xf32, #tpu.memory_space<vmem>>, vector<1x1x96xf32>
    %36 = vector.shape_cast %35 : vector<1x1x96xf32> to vector<1x96xf32>
    %37 = vector.broadcast %36 : vector<1x96xf32> to vector<16x96xf32>
    %38 = arith.addf %34, %37 : vector<16x96xf32>
    %39 = vector.extract_strided_slice %38 {offsets = [0, 0], sizes = [16, 32], strides = [1, 1]} : vector<16x96xf32> to vector<16x32xf32>
    %cst_20 = arith.constant 0.353553385 : f32
    %40 = vector.broadcast %cst_20 : f32 to vector<16x32xf32>
    %41 = arith.mulf %39, %40 : vector<16x32xf32>
    %42 = arith.truncf %41 : vector<16x32xf32> to vector<16x32xbf16>
    %43 = vector.shape_cast %42 : vector<16x32xbf16> to vector<2x8x32xbf16>
    %44 = vector.extract_strided_slice %38 {offsets = [0, 32], sizes = [16, 32], strides = [1, 1]} : vector<16x96xf32> to vector<16x32xf32>
    %45 = arith.truncf %44 : vector<16x32xf32> to vector<16x32xbf16>
    %46 = vector.shape_cast %45 : vector<16x32xbf16> to vector<2x8x32xbf16>
    %47 = vector.extract_strided_slice %38 {offsets = [0, 64], sizes = [16, 32], strides = [1, 1]} : vector<16x96xf32> to vector<16x32xf32>
    %48 = arith.truncf %47 : vector<16x32xf32> to vector<16x32xbf16>
    %49 = vector.shape_cast %48 : vector<16x32xbf16> to vector<2x8x32xbf16>
    %50 = tpu.iota {dimensions = array<i32: 0>} : vector<8x8xi32>
    %51 = tpu.iota {dimensions = array<i32: 1>} : vector<8x8xi32>
    %52 = arith.cmpi sgt, %51, %50 : vector<8x8xi32>
    %c0_21 = arith.constant 0 : index
    %c0_22 = arith.constant 0 : index
    %c0_23 = arith.constant 0 : index
    %53 = vector.load %arg7[%c0_21, %c0_22, %c0_23] : memref<1x32x32xbf16, #tpu.memory_space<vmem>>, vector<1x32x32xbf16>
    %54 = vector.shape_cast %53 : vector<1x32x32xbf16> to vector<32x32xbf16>
    %cst_24 = arith.constant 0.000000e+00 : f32
    %55 = vector.broadcast %cst_24 : f32 to vector<16x32xf32>
    %56 = vector.extract_strided_slice %43 {offsets = [0, 0, 0], sizes = [2, 8, 8], strides = [1, 1, 1]} : vector<2x8x32xbf16> to vector<2x8x8xbf16>
    %57 = vector.extract_strided_slice %46 {offsets = [0, 0, 0], sizes = [2, 8, 8], strides = [1, 1, 1]} : vector<2x8x32xbf16> to vector<2x8x8xbf16>
    %58 = vector.extract_strided_slice %49 {offsets = [0, 0, 0], sizes = [2, 8, 8], strides = [1, 1, 1]} : vector<2x8x32xbf16> to vector<2x8x8xbf16>
    "tpu.trace_start"() <{level = 10 : i32, message = "bqd,bkd->bqk"}> : () -> ()
    %cst_25 = arith.constant dense<0.000000e+00> : vector<2x8x8xf32>
    %59 = tpu.matmul %56, %57, %cst_25 {dimension_numbers = #tpu.dot_dimension_numbers<[2], [2], [1], [1], [0, 0, 0, 1, 1, 1], [0], [0]>} : vector<2x8x8xbf16>, vector<2x8x8xbf16>, vector<2x8x8xf32> -> vector<2x8x8xf32>
    %cst_26 = arith.constant -1.000000e+30 : f32
    "tpu.trace_stop"() : () -> ()
    %60 = vector.shape_cast %52 : vector<8x8xi1> to vector<1x8x8xi1>
    %61 = vector.broadcast %60 : vector<1x8x8xi1> to vector<2x8x8xi1>
    %62 = vector.broadcast %cst_26 : f32 to vector<2x8x8xf32>
    %63 = arith.select %61, %62, %59 : vector<2x8x8xi1>, vector<2x8x8xf32>
    %cst_27 = arith.constant dense<0xFF800000> : vector<2x8xf32>
    %64 = vector.multi_reduction <maximumf>, %63, %cst_27 [2] : vector<2x8x8xf32> to vector<2x8xf32>
    %65 = vector.shape_cast %64 : vector<2x8xf32> to vector<2x8x1xf32>
    %66 = vector.broadcast %65 : vector<2x8x1xf32> to vector<2x8x8xf32>
    %67 = arith.subf %63, %66 : vector<2x8x8xf32>
    %68 = math.exp %67 : vector<2x8x8xf32>
    %cst_28 = arith.constant dense<0.000000e+00> : vector<2x8xf32>
    %69 = vector.multi_reduction <add>, %68, %cst_28 [2] : vector<2x8x8xf32> to vector<2x8xf32>
    %70 = vector.shape_cast %69 : vector<2x8xf32> to vector<2x8x1xf32>
    %71 = tpu.reciprocal %70 {approx = true} : vector<2x8x1xf32> -> vector<2x8x1xf32>
    %72 = vector.broadcast %71 : vector<2x8x1xf32> to vector<2x8x8xf32>
    %73 = arith.mulf %68, %72 : vector<2x8x8xf32>
    %74 = arith.truncf %73 : vector<2x8x8xf32> to vector<2x8x8xbf16>
    "tpu.trace_start"() <{level = 10 : i32, message = "bqk,bkd->bqd"}> : () -> ()
    %cst_29 = arith.constant dense<0.000000e+00> : vector<2x8x8xf32>
    %75 = tpu.matmul %74, %58, %cst_29 {dimension_numbers = #tpu.dot_dimension_numbers<[2], [1], [1], [2], [0, 0, 0, 1, 1, 2], [0], [0]>} : vector<2x8x8xbf16>, vector<2x8x8xbf16>, vector<2x8x8xf32> -> vector<2x8x8xf32>
    "tpu.trace_stop"() : () -> ()
    %76 = vector.shape_cast %75 : vector<2x8x8xf32> to vector<16x8xf32>
    %77 = arith.truncf %76 : vector<16x8xf32> to vector<16x8xbf16>
    %78 = vector.extract_strided_slice %54 {offsets = [0, 0], sizes = [8, 32], strides = [1, 1]} : vector<32x32xbf16> to vector<8x32xbf16>
    %cst_30 = arith.constant dense<0.000000e+00> : vector<16x32xf32>
    %79 = tpu.matmul %77, %78, %cst_30 {dimension_numbers = #tpu.dot_dimension_numbers<[1], [0], [0], [1], [0, 0, 1, 1], [], []>} : vector<16x8xbf16>, vector<8x32xbf16>, vector<16x32xf32> -> vector<16x32xf32>
    %80 = arith.addf %55, %79 : vector<16x32xf32>
    %81 = vector.extract_strided_slice %43 {offsets = [0, 0, 8], sizes = [2, 8, 8], strides = [1, 1, 1]} : vector<2x8x32xbf16> to vector<2x8x8xbf16>
    %82 = vector.extract_strided_slice %46 {offsets = [0, 0, 8], sizes = [2, 8, 8], strides = [1, 1, 1]} : vector<2x8x32xbf16> to vector<2x8x8xbf16>
    %83 = vector.extract_strided_slice %49 {offsets = [0, 0, 8], sizes = [2, 8, 8], strides = [1, 1, 1]} : vector<2x8x32xbf16> to vector<2x8x8xbf16>
    "tpu.trace_start"() <{level = 10 : i32, message = "bqd,bkd->bqk"}> : () -> ()
    %cst_31 = arith.constant dense<0.000000e+00> : vector<2x8x8xf32>
    %84 = tpu.matmul %81, %82, %cst_31 {dimension_numbers = #tpu.dot_dimension_numbers<[2], [2], [1], [1], [0, 0, 0, 1, 1, 1], [0], [0]>} : vector<2x8x8xbf16>, vector<2x8x8xbf16>, vector<2x8x8xf32> -> vector<2x8x8xf32>
    %cst_32 = arith.constant -1.000000e+30 : f32
    "tpu.trace_stop"() : () -> ()
    %85 = vector.shape_cast %52 : vector<8x8xi1> to vector<1x8x8xi1>
    %86 = vector.broadcast %85 : vector<1x8x8xi1> to vector<2x8x8xi1>
    %87 = vector.broadcast %cst_32 : f32 to vector<2x8x8xf32>
    %88 = arith.select %86, %87, %84 : vector<2x8x8xi1>, vector<2x8x8xf32>
    %cst_33 = arith.constant dense<0xFF800000> : vector<2x8xf32>
    %89 = vector.multi_reduction <maximumf>, %88, %cst_33 [2] : vector<2x8x8xf32> to vector<2x8xf32>
    %90 = vector.shape_cast %89 : vector<2x8xf32> to vector<2x8x1xf32>
    %91 = vector.broadcast %90 : vector<2x8x1xf32> to vector<2x8x8xf32>
    %92 = arith.subf %88, %91 : vector<2x8x8xf32>
    %93 = math.exp %92 : vector<2x8x8xf32>
    %cst_34 = arith.constant dense<0.000000e+00> : vector<2x8xf32>
    %94 = vector.multi_reduction <add>, %93, %cst_34 [2] : vector<2x8x8xf32> to vector<2x8xf32>
    %95 = vector.shape_cast %94 : vector<2x8xf32> to vector<2x8x1xf32>
    %96 = tpu.reciprocal %95 {approx = true} : vector<2x8x1xf32> -> vector<2x8x1xf32>
    %97 = vector.broadcast %96 : vector<2x8x1xf32> to vector<2x8x8xf32>
    %98 = arith.mulf %93, %97 : vector<2x8x8xf32>
    %99 = arith.truncf %98 : vector<2x8x8xf32> to vector<2x8x8xbf16>
    "tpu.trace_start"() <{level = 10 : i32, message = "bqk,bkd->bqd"}> : () -> ()
    %cst_35 = arith.constant dense<0.000000e+00> : vector<2x8x8xf32>
    %100 = tpu.matmul %99, %83, %cst_35 {dimension_numbers = #tpu.dot_dimension_numbers<[2], [1], [1], [2], [0, 0, 0, 1, 1, 2], [0], [0]>} : vector<2x8x8xbf16>, vector<2x8x8xbf16>, vector<2x8x8xf32> -> vector<2x8x8xf32>
    "tpu.trace_stop"() : () -> ()
    %101 = vector.shape_cast %100 : vector<2x8x8xf32> to vector<16x8xf32>
    %102 = arith.truncf %101 : vector<16x8xf32> to vector<16x8xbf16>
    %103 = vector.extract_strided_slice %54 {offsets = [8, 0], sizes = [8, 32], strides = [1, 1]} : vector<32x32xbf16> to vector<8x32xbf16>
    %cst_36 = arith.constant dense<0.000000e+00> : vector<16x32xf32>
    %104 = tpu.matmul %102, %103, %cst_36 {dimension_numbers = #tpu.dot_dimension_numbers<[1], [0], [0], [1], [0, 0, 1, 1], [], []>} : vector<16x8xbf16>, vector<8x32xbf16>, vector<16x32xf32> -> vector<16x32xf32>
    %105 = arith.addf %80, %104 : vector<16x32xf32>
    %106 = vector.extract_strided_slice %43 {offsets = [0, 0, 16], sizes = [2, 8, 8], strides = [1, 1, 1]} : vector<2x8x32xbf16> to vector<2x8x8xbf16>
    %107 = vector.extract_strided_slice %46 {offsets = [0, 0, 16], sizes = [2, 8, 8], strides = [1, 1, 1]} : vector<2x8x32xbf16> to vector<2x8x8xbf16>
    %108 = vector.extract_strided_slice %49 {offsets = [0, 0, 16], sizes = [2, 8, 8], strides = [1, 1, 1]} : vector<2x8x32xbf16> to vector<2x8x8xbf16>
    "tpu.trace_start"() <{level = 10 : i32, message = "bqd,bkd->bqk"}> : () -> ()
    %cst_37 = arith.constant dense<0.000000e+00> : vector<2x8x8xf32>
    %109 = tpu.matmul %106, %107, %cst_37 {dimension_numbers = #tpu.dot_dimension_numbers<[2], [2], [1], [1], [0, 0, 0, 1, 1, 1], [0], [0]>} : vector<2x8x8xbf16>, vector<2x8x8xbf16>, vector<2x8x8xf32> -> vector<2x8x8xf32>
    %cst_38 = arith.constant -1.000000e+30 : f32
    "tpu.trace_stop"() : () -> ()
    %110 = vector.shape_cast %52 : vector<8x8xi1> to vector<1x8x8xi1>
    %111 = vector.broadcast %110 : vector<1x8x8xi1> to vector<2x8x8xi1>
    %112 = vector.broadcast %cst_38 : f32 to vector<2x8x8xf32>
    %113 = arith.select %111, %112, %109 : vector<2x8x8xi1>, vector<2x8x8xf32>
    %cst_39 = arith.constant dense<0xFF800000> : vector<2x8xf32>
    %114 = vector.multi_reduction <maximumf>, %113, %cst_39 [2] : vector<2x8x8xf32> to vector<2x8xf32>
    %115 = vector.shape_cast %114 : vector<2x8xf32> to vector<2x8x1xf32>
    %116 = vector.broadcast %115 : vector<2x8x1xf32> to vector<2x8x8xf32>
    %117 = arith.subf %113, %116 : vector<2x8x8xf32>
    %118 = math.exp %117 : vector<2x8x8xf32>
    %cst_40 = arith.constant dense<0.000000e+00> : vector<2x8xf32>
    %119 = vector.multi_reduction <add>, %118, %cst_40 [2] : vector<2x8x8xf32> to vector<2x8xf32>
    %120 = vector.shape_cast %119 : vector<2x8xf32> to vector<2x8x1xf32>
    %121 = tpu.reciprocal %120 {approx = true} : vector<2x8x1xf32> -> vector<2x8x1xf32>
    %122 = vector.broadcast %121 : vector<2x8x1xf32> to vector<2x8x8xf32>
    %123 = arith.mulf %118, %122 : vector<2x8x8xf32>
    %124 = arith.truncf %123 : vector<2x8x8xf32> to vector<2x8x8xbf16>
    "tpu.trace_start"() <{level = 10 : i32, message = "bqk,bkd->bqd"}> : () -> ()
    %cst_41 = arith.constant dense<0.000000e+00> : vector<2x8x8xf32>
    %125 = tpu.matmul %124, %108, %cst_41 {dimension_numbers = #tpu.dot_dimension_numbers<[2], [1], [1], [2], [0, 0, 0, 1, 1, 2], [0], [0]>} : vector<2x8x8xbf16>, vector<2x8x8xbf16>, vector<2x8x8xf32> -> vector<2x8x8xf32>
    "tpu.trace_stop"() : () -> ()
    %126 = vector.shape_cast %125 : vector<2x8x8xf32> to vector<16x8xf32>
    %127 = arith.truncf %126 : vector<16x8xf32> to vector<16x8xbf16>
    %128 = vector.extract_strided_slice %54 {offsets = [16, 0], sizes = [8, 32], strides = [1, 1]} : vector<32x32xbf16> to vector<8x32xbf16>
    %cst_42 = arith.constant dense<0.000000e+00> : vector<16x32xf32>
    %129 = tpu.matmul %127, %128, %cst_42 {dimension_numbers = #tpu.dot_dimension_numbers<[1], [0], [0], [1], [0, 0, 1, 1], [], []>} : vector<16x8xbf16>, vector<8x32xbf16>, vector<16x32xf32> -> vector<16x32xf32>
    %130 = arith.addf %105, %129 : vector<16x32xf32>
    %131 = vector.extract_strided_slice %43 {offsets = [0, 0, 24], sizes = [2, 8, 8], strides = [1, 1, 1]} : vector<2x8x32xbf16> to vector<2x8x8xbf16>
    %132 = vector.extract_strided_slice %46 {offsets = [0, 0, 24], sizes = [2, 8, 8], strides = [1, 1, 1]} : vector<2x8x32xbf16> to vector<2x8x8xbf16>
    %133 = vector.extract_strided_slice %49 {offsets = [0, 0, 24], sizes = [2, 8, 8], strides = [1, 1, 1]} : vector<2x8x32xbf16> to vector<2x8x8xbf16>
    "tpu.trace_start"() <{level = 10 : i32, message = "bqd,bkd->bqk"}> : () -> ()
    %cst_43 = arith.constant dense<0.000000e+00> : vector<2x8x8xf32>
    %134 = tpu.matmul %131, %132, %cst_43 {dimension_numbers = #tpu.dot_dimension_numbers<[2], [2], [1], [1], [0, 0, 0, 1, 1, 1], [0], [0]>} : vector<2x8x8xbf16>, vector<2x8x8xbf16>, vector<2x8x8xf32> -> vector<2x8x8xf32>
    %cst_44 = arith.constant -1.000000e+30 : f32
    "tpu.trace_stop"() : () -> ()
    %135 = vector.shape_cast %52 : vector<8x8xi1> to vector<1x8x8xi1>
    %136 = vector.broadcast %135 : vector<1x8x8xi1> to vector<2x8x8xi1>
    %137 = vector.broadcast %cst_44 : f32 to vector<2x8x8xf32>
    %138 = arith.select %136, %137, %134 : vector<2x8x8xi1>, vector<2x8x8xf32>
    %cst_45 = arith.constant dense<0xFF800000> : vector<2x8xf32>
    %139 = vector.multi_reduction <maximumf>, %138, %cst_45 [2] : vector<2x8x8xf32> to vector<2x8xf32>
    %140 = vector.shape_cast %139 : vector<2x8xf32> to vector<2x8x1xf32>
    %141 = vector.broadcast %140 : vector<2x8x1xf32> to vector<2x8x8xf32>
    %142 = arith.subf %138, %141 : vector<2x8x8xf32>
    %143 = math.exp %142 : vector<2x8x8xf32>
    %cst_46 = arith.constant dense<0.000000e+00> : vector<2x8xf32>
    %144 = vector.multi_reduction <add>, %143, %cst_46 [2] : vector<2x8x8xf32> to vector<2x8xf32>
    %145 = vector.shape_cast %144 : vector<2x8xf32> to vector<2x8x1xf32>
    %146 = tpu.reciprocal %145 {approx = true} : vector<2x8x1xf32> -> vector<2x8x1xf32>
    %147 = vector.broadcast %146 : vector<2x8x1xf32> to vector<2x8x8xf32>
    %148 = arith.mulf %143, %147 : vector<2x8x8xf32>
    %149 = arith.truncf %148 : vector<2x8x8xf32> to vector<2x8x8xbf16>
    "tpu.trace_start"() <{level = 10 : i32, message = "bqk,bkd->bqd"}> : () -> ()
    %cst_47 = arith.constant dense<0.000000e+00> : vector<2x8x8xf32>
    %150 = tpu.matmul %149, %133, %cst_47 {dimension_numbers = #tpu.dot_dimension_numbers<[2], [1], [1], [2], [0, 0, 0, 1, 1, 2], [0], [0]>} : vector<2x8x8xbf16>, vector<2x8x8xbf16>, vector<2x8x8xf32> -> vector<2x8x8xf32>
    "tpu.trace_stop"() : () -> ()
    %151 = vector.shape_cast %150 : vector<2x8x8xf32> to vector<16x8xf32>
    %152 = arith.truncf %151 : vector<16x8xf32> to vector<16x8xbf16>
    %153 = vector.extract_strided_slice %54 {offsets = [24, 0], sizes = [8, 32], strides = [1, 1]} : vector<32x32xbf16> to vector<8x32xbf16>
    %cst_48 = arith.constant dense<0.000000e+00> : vector<16x32xf32>
    %154 = tpu.matmul %152, %153, %cst_48 {dimension_numbers = #tpu.dot_dimension_numbers<[1], [0], [0], [1], [0, 0, 1, 1], [], []>} : vector<16x8xbf16>, vector<8x32xbf16>, vector<16x32xf32> -> vector<16x32xf32>
    %155 = arith.addf %130, %154 : vector<16x32xf32>
    %c0_49 = arith.constant 0 : index
    %c0_50 = arith.constant 0 : index
    %c0_51 = arith.constant 0 : index
    %156 = vector.load %arg8[%c0_49, %c0_50, %c0_51] : memref<1x1x32xf32, #tpu.memory_space<vmem>>, vector<1x1x32xf32>
    %157 = vector.shape_cast %156 : vector<1x1x32xf32> to vector<1x32xf32>
    %158 = vector.broadcast %157 : vector<1x32xf32> to vector<16x32xf32>
    %159 = arith.addf %155, %158 : vector<16x32xf32>
    %160 = arith.addf %4, %159 : vector<16x32xf32>
    %c0_52 = arith.constant 0 : index
    %c0_53 = arith.constant 0 : index
    %c0_54 = arith.constant 0 : index
    %161 = vector.load %arg9[%c0_52, %c0_53, %c0_54] : memref<1x1x32xf32, #tpu.memory_space<vmem>>, vector<1x1x32xf32>
    %162 = vector.shape_cast %161 : vector<1x1x32xf32> to vector<1x32xf32>
    %c0_55 = arith.constant 0 : index
    %c0_56 = arith.constant 0 : index
    %c0_57 = arith.constant 0 : index
    %163 = vector.load %arg10[%c0_55, %c0_56, %c0_57] : memref<1x1x32xf32, #tpu.memory_space<vmem>>, vector<1x1x32xf32>
    %164 = vector.shape_cast %163 : vector<1x1x32xf32> to vector<1x32xf32>
    %cst_58 = arith.constant dense<0.000000e+00> : vector<16xf32>
    %165 = vector.multi_reduction <add>, %160, %cst_58 [1] : vector<16x32xf32> to vector<16xf32>
    %166 = vector.shape_cast %165 : vector<16xf32> to vector<16x1xf32>
    %cst_59 = arith.constant 3.200000e+01 : f32
    %167 = vector.broadcast %cst_59 : f32 to vector<16x1xf32>
    %168 = arith.divf %166, %167 : vector<16x1xf32>
    %169 = vector.broadcast %168 : vector<16x1xf32> to vector<16x32xf32>
    %170 = arith.subf %160, %169 : vector<16x32xf32>
    %171 = arith.mulf %170, %170 : vector<16x32xf32>
    %cst_60 = arith.constant dense<0.000000e+00> : vector<16xf32>
    %172 = vector.multi_reduction <add>, %171, %cst_60 [1] : vector<16x32xf32> to vector<16xf32>
    %173 = vector.shape_cast %172 : vector<16xf32> to vector<16x1xf32>
    %cst_61 = arith.constant 3.200000e+01 : f32
    %174 = vector.broadcast %cst_61 : f32 to vector<16x1xf32>
    %175 = arith.divf %173, %174 : vector<16x1xf32>
    %176 = vector.broadcast %168 : vector<16x1xf32> to vector<16x32xf32>
    %177 = arith.subf %160, %176 : vector<16x32xf32>
    %cst_62 = arith.constant 9.99999974E-6 : f32
    %178 = vector.broadcast %cst_62 : f32 to vector<16x1xf32>
    %179 = arith.addf %175, %178 : vector<16x1xf32>
    %180 = math.rsqrt %179 : vector<16x1xf32>
    %181 = vector.broadcast %180 : vector<16x1xf32> to vector<16x32xf32>
    %182 = arith.mulf %177, %181 : vector<16x32xf32>
    %183 = vector.broadcast %162 : vector<1x32xf32> to vector<16x32xf32>
    %184 = arith.mulf %182, %183 : vector<16x32xf32>
    %185 = vector.broadcast %164 : vector<1x32xf32> to vector<16x32xf32>
    %186 = arith.addf %184, %185 : vector<16x32xf32>
    %187 = arith.truncf %186 : vector<16x32xf32> to vector<16x32xbf16>
    %c0_63 = arith.constant 0 : index
    %c0_64 = arith.constant 0 : index
    %c0_65 = arith.constant 0 : index
    %188 = vector.load %arg11[%c0_63, %c0_64, %c0_65] : memref<1x32x128xbf16, #tpu.memory_space<vmem>>, vector<1x32x128xbf16>
    %189 = vector.shape_cast %188 : vector<1x32x128xbf16> to vector<32x128xbf16>
    %cst_66 = arith.constant dense<0.000000e+00> : vector<16x128xf32>
    %190 = tpu.matmul %187, %189, %cst_66 {dimension_numbers = #tpu.dot_dimension_numbers<[1], [0], [0], [1], [0, 0, 1, 1], [], []>} : vector<16x32xbf16>, vector<32x128xbf16>, vector<16x128xf32> -> vector<16x128xf32>
    %c0_67 = arith.constant 0 : index
    %c0_68 = arith.constant 0 : index
    %c0_69 = arith.constant 0 : index
    %191 = vector.load %arg12[%c0_67, %c0_68, %c0_69] : memref<1x1x128xf32, #tpu.memory_space<vmem>>, vector<1x1x128xf32>
    %192 = vector.shape_cast %191 : vector<1x1x128xf32> to vector<1x128xf32>
    %193 = vector.broadcast %192 : vector<1x128xf32> to vector<16x128xf32>
    %194 = arith.addf %190, %193 : vector<16x128xf32>
    %cst_70 = arith.constant 5.000000e-01 : f32
    %195 = vector.broadcast %cst_70 : f32 to vector<16x128xf32>
    %196 = arith.mulf %195, %194 : vector<16x128xf32>
    %cst_71 = arith.constant 0.707106769 : f32
    %197 = vector.broadcast %cst_71 : f32 to vector<16x128xf32>
    %198 = arith.mulf %194, %197 : vector<16x128xf32>
    %199 = math.erf %198 : vector<16x128xf32>
    %cst_72 = arith.constant 1.000000e+00 : f32
    %200 = vector.broadcast %cst_72 : f32 to vector<16x128xf32>
    %201 = arith.addf %200, %199 : vector<16x128xf32>
    %202 = arith.mulf %196, %201 : vector<16x128xf32>
    %203 = arith.truncf %202 : vector<16x128xf32> to vector<16x128xbf16>
    %c0_73 = arith.constant 0 : index
    %c0_74 = arith.constant 0 : index
    %c0_75 = arith.constant 0 : index
    %204 = vector.load %arg13[%c0_73, %c0_74, %c0_75] : memref<1x128x32xbf16, #tpu.memory_space<vmem>>, vector<1x128x32xbf16>
    %205 = vector.shape_cast %204 : vector<1x128x32xbf16> to vector<128x32xbf16>
    %cst_76 = arith.constant dense<0.000000e+00> : vector<16x32xf32>
    %206 = tpu.matmul %203, %205, %cst_76 {dimension_numbers = #tpu.dot_dimension_numbers<[1], [0], [0], [1], [0, 0, 1, 1], [], []>} : vector<16x128xbf16>, vector<128x32xbf16>, vector<16x32xf32> -> vector<16x32xf32>
    %c0_77 = arith.constant 0 : index
    %c0_78 = arith.constant 0 : index
    %c0_79 = arith.constant 0 : index
    %207 = vector.load %arg14[%c0_77, %c0_78, %c0_79] : memref<1x1x32xf32, #tpu.memory_space<vmem>>, vector<1x1x32xf32>
    %208 = vector.shape_cast %207 : vector<1x1x32xf32> to vector<1x32xf32>
    %209 = vector.broadcast %208 : vector<1x32xf32> to vector<16x32xf32>
    %210 = arith.addf %206, %209 : vector<16x32xf32>
    %211 = arith.addf %160, %210 : vector<16x32xf32>
    %c1_i32 = arith.constant 1 : i32
    %212 = arith.cmpi slt, %arg1, %c1_i32 : i32
    %213 = arith.extui %212 : i1 to i32
    %c0_i32_80 = arith.constant 0 : i32
    %214 = arith.cmpi ne, %213, %c0_i32_80 : i32
    scf.if %214 {
      %218 = vector.shape_cast %211 : vector<16x32xf32> to vector<2x8x32xf32>
      %c0_83 = arith.constant 0 : index
      %c0_84 = arith.constant 0 : index
      %c0_85 = arith.constant 0 : index
      %219 = vector.load %arg17[%c0_83, %c0_84, %c0_85] : memref<2x8x32xf32, #tpu.memory_space<vmem>>, vector<2x8x32xf32>
      tpu.vector_store %arg17[%c0_83, %c0_84, %c0_85], %218 {strides = array<i32>} : memref<2x8x32xf32, #tpu.memory_space<vmem>>, vector<2x8x32xf32>,
    } else {
    }
    %c1_i32_81 = arith.constant 1 : i32
    %215 = arith.cmpi eq, %arg1, %c1_i32_81 : i32
    %216 = arith.extui %215 : i1 to i32
    %c0_i32_82 = arith.constant 0 : i32
    %217 = arith.cmpi ne, %216, %c0_i32_82 : i32
    scf.if %217 {
      %c0_83 = arith.constant 0 : index
      %c0_84 = arith.constant 0 : index
      %218 = vector.load %arg15[%c0_83, %c0_84] : memref<1x32xf32, #tpu.memory_space<vmem>>, vector<1x32xf32>
      %c0_85 = arith.constant 0 : index
      %c0_86 = arith.constant 0 : index
      %219 = vector.load %arg16[%c0_85, %c0_86] : memref<1x32xf32, #tpu.memory_space<vmem>>, vector<1x32xf32>
      %cst_87 = arith.constant dense<0.000000e+00> : vector<16xf32>
      %220 = vector.multi_reduction <add>, %211, %cst_87 [1] : vector<16x32xf32> to vector<16xf32>
      %221 = vector.shape_cast %220 : vector<16xf32> to vector<16x1xf32>
      %cst_88 = arith.constant 3.200000e+01 : f32
      %222 = vector.broadcast %cst_88 : f32 to vector<16x1xf32>
      %223 = arith.divf %221, %222 : vector<16x1xf32>
      %224 = vector.broadcast %223 : vector<16x1xf32> to vector<16x32xf32>
      %225 = arith.subf %211, %224 : vector<16x32xf32>
      %226 = arith.mulf %225, %225 : vector<16x32xf32>
      %cst_89 = arith.constant dense<0.000000e+00> : vector<16xf32>
      %227 = vector.multi_reduction <add>, %226, %cst_89 [1] : vector<16x32xf32> to vector<16xf32>
      %228 = vector.shape_cast %227 : vector<16xf32> to vector<16x1xf32>
      %cst_90 = arith.constant 3.200000e+01 : f32
      %229 = vector.broadcast %cst_90 : f32 to vector<16x1xf32>
      %230 = arith.divf %228, %229 : vector<16x1xf32>
      %231 = vector.broadcast %223 : vector<16x1xf32> to vector<16x32xf32>
      %232 = arith.subf %211, %231 : vector<16x32xf32>
      %cst_91 = arith.constant 9.99999974E-6 : f32
      %233 = vector.broadcast %cst_91 : f32 to vector<16x1xf32>
      %234 = arith.addf %230, %233 : vector<16x1xf32>
      %235 = math.rsqrt %234 : vector<16x1xf32>
      %236 = vector.broadcast %235 : vector<16x1xf32> to vector<16x32xf32>
      %237 = arith.mulf %232, %236 : vector<16x32xf32>
      %238 = vector.broadcast %218 : vector<1x32xf32> to vector<16x32xf32>
      %239 = arith.mulf %237, %238 : vector<16x32xf32>
      %240 = vector.broadcast %219 : vector<1x32xf32> to vector<16x32xf32>
      %241 = arith.addf %239, %240 : vector<16x32xf32>
      %242 = vector.shape_cast %241 : vector<16x32xf32> to vector<2x8x32xf32>
      %c0_92 = arith.constant 0 : index
      %c0_93 = arith.constant 0 : index
      %c0_94 = arith.constant 0 : index
      %243 = vector.load %arg17[%c0_92, %c0_93, %c0_94] : memref<2x8x32xf32, #tpu.memory_space<vmem>>, vector<2x8x32xf32>
      tpu.vector_store %arg17[%c0_92, %c0_93, %c0_94], %242 {strides = array<i32>} : memref<2x8x32xf32, #tpu.memory_space<vmem>>, vector<2x8x32xf32>,
    } else {
    }
    return
  }
  func.func @transform_0(%arg0: i32, %arg1: i32) -> (i32, i32, i32) {
    %c0_i32 = arith.constant 0 : i32
    %c0_i32_0 = arith.constant 0 : i32
    %c0_i32_1 = arith.constant 0 : i32
    return %arg0, %c0_i32, %c0_i32_0 : i32, i32, i32
  }
  func.func @transform_1(%arg0: i32, %arg1: i32) -> (i32, i32, i32) {
    %c0_i32 = arith.constant 0 : i32
    %c0_i32_0 = arith.constant 0 : i32
    %c0_i32_1 = arith.constant 0 : i32
    return %arg1, %c0_i32, %c0_i32_0 : i32, i32, i32
  }
  func.func @transform_2(%arg0: i32, %arg1: i32) -> (i32, i32, i32) {
    %c0_i32 = arith.constant 0 : i32
    %c0_i32_0 = arith.constant 0 : i32
    %c0_i32_1 = arith.constant 0 : i32
    return %arg1, %c0_i32, %c0_i32_0 : i32, i32, i32
  }
  func.func @transform_3(%arg0: i32, %arg1: i32) -> (i32, i32, i32) {
    %c0_i32 = arith.constant 0 : i32
    %c0_i32_0 = arith.constant 0 : i32
    %c0_i32_1 = arith.constant 0 : i32
    return %arg1, %c0_i32, %c0_i32_0 : i32, i32, i32
  }
  func.func @transform_4(%arg0: i32, %arg1: i32) -> (i32, i32, i32) {
    %c0_i32 = arith.constant 0 : i32
    %c0_i32_0 = arith.constant 0 : i32
    %c0_i32_1 = arith.constant 0 : i32
    return %arg1, %c0_i32, %c0_i32_0 : i32, i32, i32
  }
  func.func @transform_5(%arg0: i32, %arg1: i32) -> (i32, i32, i32) {
    %c0_i32 = arith.constant 0 : i32
    %c0_i32_0 = arith.constant 0 : i32
    %c0_i32_1 = arith.constant 0 : i32
    return %arg1, %c0_i32, %c0_i32_0 : i32, i32, i32
  }
  func.func @transform_6(%arg0: i32, %arg1: i32) -> (i32, i32, i32) {
    %c0_i32 = arith.constant 0 : i32
    %c0_i32_0 = arith.constant 0 : i32
    %c0_i32_1 = arith.constant 0 : i32
    return %arg1, %c0_i32, %c0_i32_0 : i32, i32, i32
  }
  func.func @transform_7(%arg0: i32, %arg1: i32) -> (i32, i32, i32) {
    %c0_i32 = arith.constant 0 : i32
    %c0_i32_0 = arith.constant 0 : i32
    %c0_i32_1 = arith.constant 0 : i32
    return %arg1, %c0_i32, %c0_i32_0 : i32, i32, i32
  }
  func.func @transform_8(%arg0: i32, %arg1: i32) -> (i32, i32, i32) {
    %c0_i32 = arith.constant 0 : i32
    %c0_i32_0 = arith.constant 0 : i32
    %c0_i32_1 = arith.constant 0 : i32
    return %arg1, %c0_i32, %c0_i32_0 : i32, i32, i32
  }
  func.func @transform_9(%arg0: i32, %arg1: i32) -> (i32, i32, i32) {
    %c0_i32 = arith.constant 0 : i32
    %c0_i32_0 = arith.constant 0 : i32
    %c0_i32_1 = arith.constant 0 : i32
    return %arg1, %c0_i32, %c0_i32_0 : i32, i32, i32
  }
  func.func @transform_10(%arg0: i32, %arg1: i32) -> (i32, i32, i32) {
    %c0_i32 = arith.constant 0 : i32
    %c0_i32_0 = arith.constant 0 : i32
    %c0_i32_1 = arith.constant 0 : i32
    return %arg1, %c0_i32, %c0_i32_0 : i32, i32, i32
  }
  func.func @transform_11(%arg0: i32, %arg1: i32) -> (i32, i32, i32) {
    %c0_i32 = arith.constant 0 : i32
    %c0_i32_0 = arith.constant 0 : i32
    %c0_i32_1 = arith.constant 0 : i32
    return %arg1, %c0_i32, %c0_i32_0 : i32, i32, i32
  }
  func.func @transform_12(%arg0: i32, %arg1: i32) -> (i32, i32, i32) {
    %c0_i32 = arith.constant 0 : i32
    %c0_i32_0 = arith.constant 0 : i32
    %c0_i32_1 = arith.constant 0 : i32
    return %arg1, %c0_i32, %c0_i32_0 : i32, i32, i32
  }
  func.func @transform_13(%arg0: i32, %arg1: i32) -> (i32, i32) {
    %c0_i32 = arith.constant 0 : i32
    %c0_i32_0 = arith.constant 0 : i32
    %c0_i32_1 = arith.constant 0 : i32
    return %c0_i32, %c0_i32_0 : i32, i32
  }
  func.func @transform_14(%arg0: i32, %arg1: i32) -> (i32, i32) {
    %c0_i32 = arith.constant 0 : i32
    %c0_i32_0 = arith.constant 0 : i32
    %c0_i32_1 = arith.constant 0 : i32
    return %c0_i32, %c0_i32_0 : i32, i32
  }
  func.func @transform_15(%arg0: i32, %arg1: i32) -> (i32, i32, i32) {
    %c0_i32 = arith.constant 0 : i32
    %c0_i32_0 = arith.constant 0 : i32
    %c0_i32_1 = arith.constant 0 : i32
    return %arg0, %c0_i32, %c0_i32_0 : i32, i32, i32
  }
}

</mosaic_0001>

<bundles_post_ra>
// kernel: tpu_custom_call.1
= control target key start
LH: loop header
LB: loop body
LE: loop exit
PB: predicated region body
PF: predicated region fallthrough
CT: control target
= control target key end

     0   :  { %s2624_s0 = inlined_call_operand.vmem [shape: f32[2,8,32], index: 0, kind: input, shape index: {}]   ;;  %s2625_s1 = inlined_call_operand.vmem [shape: f32[2,1,32], index: 1, kind: input, shape index: {}]   ;;  %s2626_s2 = inlined_call_operand.vmem [shape: f32[2,1,32], index: 2, kind: input, shape index: {}]   ;;  %s2627_s3 = inlined_call_operand.vmem [shape: bf16[2,32,96], index: 3, kind: input, shape index: {}]   ;;  %s2628_s4 = inlined_call_operand.vmem [shape: f32[2,1,96], index: 4, kind: input, shape index: {}]   ;;  %s2629_s5 = inlined_call_operand.vmem [shape: bf16[2,32,32], index: 5, kind: input, shape index: {}]   ;;  %s2630_s6 = inlined_call_operand.vmem [shape: f32[2,1,32], index: 6, kind: input, shape index: {}]   ;;  %s2631_s7 = inlined_call_operand.vmem [shape: f32[2,1,32], index: 7, kind: input, shape index: {}]   ;;  %s2632_s8 = inlined_call_operand.vmem [shape: f32[2,1,32], index: 8, kind: input, shape index: {}]   ;;  %s2633_s9 = inlined_call_operand.vmem [shape: bf16[2,32,128], index: 9, kind: input, shape index: {}]   ;;  %s2634_s10 = inlined_call_operand.vmem [shape: f32[2,1,128], index: 10, kind: input, shape index: {}]   ;;  %s2635_s11 = inlined_call_operand.vmem [shape: bf16[2,128,32], index: 11, kind: input, shape index: {}]   ;;  %s2636_s12 = inlined_call_operand.vmem [shape: f32[2,1,32], index: 12, kind: input, shape index: {}]   ;;  %s2637_s13 = inlined_call_operand.vmem [shape: f32[1,32], index: 13, kind: input, shape index: {}]   ;;  %s2638_s14 = inlined_call_operand.vmem [shape: f32[1,32], index: 14, kind: input, shape index: {}]   ;;  %s2639_s15 = inlined_call_operand.hbm [shape: f32[2,8,32], index: 15, kind: output, shape index: {}]  }
   0x1   :  { %2643 = sst [smem:[#allocation9_spill]] %s2627_s3 }
   0x2   :  { %2644 = sst [smem:[#allocation10_spill]] %s2629_s5 }
   0x3   :  { %2645 = sst [smem:[#allocation11_spill]] %s2637_s13 }
   0x4   :  { %2646 = sst [smem:[#allocation12_spill]] %s2638_s14 }
   0x5   :  { %2647 = sst [smem:[#allocation13_spill]] %s2639_s15 }
   0x6   :  { %20 = vsyncpa [#allocation3], 0  ;;  %s2272_s18 = smov 0   ;;  %s2274_s19 = smov 0  }
   0x7   :  { %s2276_s20 = smov 0  }
   0x8 LB: > { %2648 = sst [smem:[#allocation5_spill]] %s2171_s19  ;;  %s35_s22 = sadd.s32 1, %s2171_s19  ;;  %s2175_s20 = sphi %s2276_s20, %s26_s20   ;;  %s2171_s19 = sphi %s2274_s19, %s2668_s19   ;;  %s2167_s18 = sphi %s2272_s18, %s2667_s18  }
   0x9   : > { %2649 = sst [smem:[#allocation6_spill]] %s2175_s20  ;;  %p36_p0 = scmp.ge.s32.totalorder %s35_s22, 2 }
   0xa   : > { %p1912_p1 = scmp.ge.s32.totalorder %s2175_s20, 1  ;;  %p555_p2 = scmp.lt.s32.totalorder %s2175_s20, 3 }
   0xb   : > { %s2670_s22 = smov (%p36_p0, %s35_s22), 0 }
   0xc   : > { %2650 = sst [smem:[#allocation7_spill]] %s2670_s22  ;;  %p556_p3 = pnand %p1912_p1, %p555_p2 }
   0xe   : > { %559 = sbr.rel (%p556_p3) target bundleno = 2931 (0xb73), region = 80 }
  0x13   : > { %p648_p4 = scmp.lt.s32.totalorder %s2167_s18, 1  ;;  %s2651_s3 = sld [smem:[#allocation9_spill]] }
  0x14   : > { %s2652_s5 = sld [smem:[#allocation10_spill]]  ;;  %p1921_p5 = scmp.ne.s32.totalorder %s2167_s18, 0 }
  0x15   : > { %s2295_s23 = scalar_select %p648_p4, %s2167_s18, 1 }
  0x17   : > { %s2000_s30 = sshll.u32 %s2295_s23, 4  ;;  %s672_s13 = scalar_lea.vmem %s2631_s7, %s2295_s23 }
  0x18   : > { %s675_s21 = scalar_lea.vmem %s2632_s8, %s2295_s23  ;;  %s691_s16 = scalar_lea.vmem %s2636_s12, %s2295_s23 }
  0x19   : > { %s2313_s22 = scalar_lea.vmem %s2651_s3, %s2000_s30  ;;  %s2335_s3 = scalar_lea.vmem %s2633_s9, %s2000_s30 }
  0x1a   : > { %s2318_s20 = scalar_lea.vmem %s2652_s5, %s2000_s30  ;;  %s683_s5 = scalar_lea.vmem %s2634_s10, %s2295_s23 }
  0x1b   : > { %2653 = sst [smem:[#allocation8_spill]] %s2318_s20  ;;  %s2003_s20 = sshll.u32 %s2295_s23, 6 }
  0x1c   : > { %s2345_s27 = scalar_lea.vmem %s2635_s11, %s2003_s20  ;;  %697 = sbr.rel (%p1921_p5) target bundleno = 36 (0x24), region = 84 }
  0x21   : > { %v698_v0 = vld [vmem:[%s2624_s0] sm:$0xff]  ;;  %vm700_vm0 = vcmask 261120   ;;  %v699_v1 = vld [vmem:[%s2624_s0 + $0x8] sm:$0xff] }
  0x22   : > { %701 = vst.msk [vmem:[#allocation2] sm:$0xff] %vm700_vm0, %v698_v0 }
  0x23   : > { %702 = vst.msk [vmem:[#allocation2 + $0x8] sm:$0xff] %vm700_vm0, %v699_v1 }
  0x24 PF: > { %vm707_vm1 = vcmask 261120   ;;  %v2177_v6 = vmov 32.0   ;;  %v2005_v23 = vld [vmem:[%s2313_s22 + $0x8] sm:$0xff]  ;;  %v2004_v25 = vld [vmem:[%s2313_s22] sm:$0xff]  ;;  %s2654_s15 = scalar_lea.vmem %s2625_s1, %s2295_s23  ;;  %s2655_s26 = scalar_lea.vmem %s2626_s2, %s2295_s23  ;;  %vm827_vm9 = vcmask 64512   ;;  %vm904_vm10 = vcmask 1043456  }
  0x25   : > { %2069 = vrcp.f32 %v2177_v6  ;;  %799 = vmatpush.bf16.msra.mxu0 %v2005_v23  ;;  %v2061_v44 = vld [vmem:[%s2654_s15] ss:$0 sm:$0xff]  ;;  %s2656_s17 = scalar_lea.vmem %s2628_s4, %s2295_s23  ;;  %s2178_s30 = smov 96  }
  0x26   : > { %v2062_v49 = vld [vmem:[%s2655_s26] ss:$0 sm:$0xff]  ;;  %s2179_s24 = smov 88   ;;  %s2180_s25 = smov 120  }
  0x27   : > { %v2063_v54 = vld [vmem:[%s2656_s17] ss:$0 sm:$0xff]  ;;  %s2181_s20 = smov 56   ;;  %s2182_s22 = smov 80  }
  0x28   : > { %s2183_s15 = smov 64   ;;  %s2184_s19 = smov 112  }
  0x29   : > { %v2358_v2 = vld [vmem:[#allocation2] sm:$0xff]  ;;  %800 = vmatpush.bf16.msra.mxu0 %v2004_v25  ;;  %s2659_s14 = sld [smem:[#allocation8_spill]]  ;;  %s2185_s26 = smov 48  }
  0x2a   : > { %v708_v3 = vsel %vm707_vm1, %v2358_v2, 0.0  ;;  %v2362_v4 = vld [vmem:[#allocation2 + $0x8] sm:$0xff]  ;;  %s2186_s29 = smov 72   ;;  %s2187_s28 = smov 104  }
  0x2b   : > { %709 = vadd.xlane.f32.xlu0 %v708_v3  ;;  %v711_v5 = vsel %vm707_vm1, %v2362_v4, 0.0  ;;  %v2070_v7 = vpop.eup %2069  ;;  %s2188_s17 = smov 40   ;;  %p1994_p6 = scmp.ge.s32.totalorder %s2167_s18, 1 }
  0x2c   : > { %v715_v8 = vmul.f32 32.0, %v2070_v7  ;;  %vm719_vm2 = vweird.f32 %v2070_v7 }
  0x2e   : > { %v716_v9 = vsub.f32 1.0, %v715_v8 }
  0x30   : > { %v717_v10 = vmul.f32 %v2070_v7, %v716_v9 }
  0x32   : > { %v718_v11 = vadd.f32 %v2070_v7, %v717_v10 }
  0x33   : > { %712 = vadd.xlane.f32.xlu0 %v711_v5 }
  0x34   : > { %v2366_v12 = vsel %vm719_vm2, %v2070_v7, %v718_v11 }
  0x9e   : > { %v710_v13 = vpop.xlane.xlu0 %709 }
  0x9f   : > { %v721_v14 = vmul.f32 %v2366_v12, %v710_v13 }
  0xa1   : > { %v723_v15 = vsub.f32 %v2358_v2, %v721_v14 }
  0xa3   : > { %v725_v16 = vmul.f32 %v723_v15, %v723_v15 }
  0xa5   : > { %v727_v17 = vsel %vm707_vm1, %v725_v16, 0.0 }
  0xa6   : > { %728 = vadd.xlane.f32.xlu1 %v727_v17  ;;  %v713_v18 = vpop.xlane.xlu0 %712 }
  0xa7   : > { %v722_v19 = vmul.f32 %v2366_v12, %v713_v18 }
  0xa9   : > { %v724_v20 = vsub.f32 %v2362_v4, %v722_v19 }
  0xab   : > { %v726_v21 = vmul.f32 %v724_v20, %v724_v20 }
  0xad   : > { %v730_v22 = vsel %vm707_vm1, %v726_v21, 0.0 }
  0xae   : > { %731 = vadd.xlane.f32.xlu1 %v730_v22 }
 0x119   : > { %v729_v24 = vpop.xlane.xlu1 %728 }
 0x11a   : > { %v733_v26 = vmul.f32 %v729_v24, %v2366_v12  ;;  %v813_v24 = vlaneseq }
 0x11c   : > { %v735_v27 = vadd.f32 1e-05, %v733_v26  ;;  %v814_v25 = vshrl.u32 %v813_v24, 7  ;;  %v816_v26 = vand.u32 127, %v813_v24 }
 0x11e   : > { %2071 = vrsqrt.f32 %v735_v27  ;;  %vm743_vm4 = vweird.f32 %v735_v27  ;;  %vm2419_vm11 = vcmp.gt.s32.totalorder %v816_v26, %v814_v25 }
 0x121   : > { %v732_v28 = vpop.xlane.xlu1 %731 }
 0x122   : > { %v734_v29 = vmul.f32 %v732_v28, %v2366_v12 }
 0x124   : > { %v2072_v30 = vpop.eup %2071  ;;  %v736_v31 = vadd.f32 1e-05, %v734_v29 }
 0x125   : > { %v738_v32 = vmul.f32 %v2072_v30, %v735_v27  ;;  %vm744_vm3 = vweird.f32 %v2072_v30 }
 0x126   : > { %2073 = vrsqrt.f32 %v736_v31  ;;  %vm745_vm5 = vmor %vm743_vm4, %vm744_vm3  ;;  %vm753_vm7 = vweird.f32 %v736_v31 }
 0x127   : > { %v739_v33 = vmul.f32 %v2072_v30, %v738_v32 }
 0x129   : > { %v740_v34 = vmul.f32 0.5, %v739_v33 }
 0x12b   : > { %v741_v35 = vsub.f32 1.5, %v740_v34 }
 0x12c   : > { %v2074_v36 = vpop.eup %2073 }
 0x12d   : > { %v742_v37 = vmul.f32 %v2072_v30, %v741_v35  ;;  %v748_v38 = vmul.f32 %v2074_v36, %v736_v31  ;;  %vm754_vm6 = vweird.f32 %v2074_v36 }
 0x12e   : > { %vm755_vm8 = vmor %vm753_vm7, %vm754_vm6 }
 0x12f   : > { %v749_v39 = vmul.f32 %v2074_v36, %v748_v38  ;;  %v746_v40 = vsel %vm745_vm5, %v2072_v30, %v742_v37 }
 0x130   : > { %v757_v43 = vmul.f32 %v746_v40, %v723_v15 }
 0x131   : > { %v750_v41 = vmul.f32 0.5, %v749_v39 }
 0x132   : > { %v762_v48 = vmul.f32 %v2061_v44, %v757_v43 }
 0x133   : > { %v751_v42 = vsub.f32 1.5, %v750_v41 }
 0x134   : > { %v767_v51 = vadd.f32 %v2062_v49, %v762_v48 }
 0x135   : > { %v752_v45 = vmul.f32 %v2074_v36, %v751_v42 }
 0x137   : > { %v756_v46 = vsel %vm755_vm8, %v2074_v36, %v752_v45 }
 0x138   : > { %v758_v47 = vmul.f32 %v756_v46, %v724_v20 }
 0x13a   : > { %v763_v50 = vmul.f32 %v2061_v44, %v758_v47 }
 0x13c   : > { %v768_v52 = vadd.f32 %v2062_v49, %v763_v50 }
 0x13e   : > { %v769_v53 = vpack.c.bf16 %v768_v52, %v767_v51 }
 0x140   : > { %1930 = vmatmul.msk.bf16.vlgmr.msra.gmra.mxu0 %vm707_vm1, %v769_v53 }
 0x1bd   : > { %v802_v55 = vpop.f32.mrf.mxu0 }
 0x1be   : > { %v803_v56 = vadd.f32 %v2063_v54, %v802_v55 }
 0x1c0   : > { %v807_v57 = vmul.f32 0.35355338, %v803_v56  ;;  %v811_v58 = vpack.c.bf16 %v803_v56, %v803_v56 }
 0x1c2   : > { %v823_v59 = vunpack.c.l.b16 %v811_v58  ;;  %v809_v60 = vpack.c.bf16 %v807_v57, %v807_v57 }
 0x1c4   : > { %v2394_v61 = vpack.c.b16 %v823_v59, %v823_v59  ;;  %v944_v1 = vunpack.c.l.b16 %v809_v60 }
 0x1c5   : > { %v804_v62 = vpop.f32.mrf.mxu0 }
 0x1c6   : > { %v805_v63 = vadd.f32 %v2063_v54, %v804_v62  ;;  %825 = vrot.lane.b32.xlu0 %v2394_v61, %s2178_s30  ;;  %948 = vrot.lane.b32.xlu2 %v2394_v61, %s2179_s24  ;;  %v2400_v6 = vpack.c.b16 %v944_v1, %v944_v1 }
 0x1c8   : > { %v812_v0 = vpack.c.bf16 %v805_v63, %v805_v63  ;;  %v808_v7 = vmul.f32 0.35355338, %v805_v63 }
 0x1ca   : > { %v848_v3 = vunpack.c.l.b16 %v812_v0  ;;  %v810_v8 = vpack.c.bf16 %v808_v7, %v808_v7 }
 0x1cc   : > { %v2398_v5 = vpack.c.b16 %v848_v3, %v848_v3  ;;  %v970_v9 = vunpack.c.l.b16 %v810_v8 }
 0x1ce   : > { %850 = vrot.lane.b32.xlu1 %v2398_v5, %s2178_s30  ;;  %946 = vrot.lane.b32.xlu2 %v2400_v6, %s2180_s25  ;;  %v2407_v10 = vpack.c.b16 %v970_v9, %v970_v9 }
 0x1d6   : > { %1021 = vrot.lane.b32.xlu1 %v2394_v61, %s2181_s20  ;;  %974 = vrot.lane.b32.xlu2 %v2398_v5, %s2179_s24 }
 0x1de   : > { %972 = vrot.lane.b32.xlu2 %v2407_v10, %s2180_s25  ;;  %s2660_s25 = scalar_lea.vmem %s2630_s6, %s2295_s23 }
 0x220   : > { %v949_v11 = vpop.permute.xlu2 %948 }
 0x221   : > { %v954_v13 = vsel %vm827_vm9, %v949_v11, 0 }
 0x222   : > { %963 = vmatpush.bf16.xpose.msrb.mxu0 %v954_v13 }
 0x228   : > { %v947_v14 = vpop.permute.xlu2 %946 }
 0x229   : > { %1935 = vmatmul.msk.bf16.vlgmr.msrb.gmra.mxu0 %vm827_vm9, %v947_v14 }
 0x230   : > { %v975_v15 = vpop.permute.xlu2 %974 }
 0x231   : > { %v980_v16 = vsel %vm827_vm9, %v975_v15, 0 }
 0x232   : > { %989 = vmatpush.bf16.xpose.msra.mxu1 %v980_v16 }
 0x238   : > { %v826_v17 = vpop.permute.xlu0 %825  ;;  %v973_v18 = vpop.permute.xlu2 %972 }
 0x239   : > { %1936 = vmatmul.msk.bf16.vlgmr.msra.gmra.mxu1 %vm827_vm9, %v973_v18  ;;  %v832_v19 = vsel %vm827_vm9, %v826_v17, 0  ;;  %v819_v18 = vld [vmem:[%s2659_s14 + $0x4] sm:$0xf] }
 0x23a   : > { %841 = vmatpush.bf16.xpose.msra.mxu2 %v832_v19  ;;  %v1068_v19 = vsel %vm904_vm10, %v819_v18, 0 }
 0x23b   : > { %1077 = vmatpush.bf16.msra.mxu0 %v1068_v19 }
 0x240   : > { %v851_v20 = vpop.permute.xlu1 %850 }
 0x241   : > { %1931 = vmatmul.msk.bf16.vlgmr.msra.gmra.mxu2 %vm827_vm9, %v809_v60  ;;  %v856_v21 = vsel %vm827_vm9, %v851_v20, 0 }
 0x242   : > { %865 = vmatpush.bf16.xpose.msrb.mxu2 %v856_v21 }
 0x248   : > { %v1022_v22 = vpop.permute.xlu1 %1021 }
 0x249   : > { %v1027_v23 = vsel %vm904_vm10, %v1022_v22, 0 }
 0x24a   : > { %1036 = vmatpush.bf16.msra.mxu2 %v1027_v23 }
 0x251   : > { %1932 = vmatmul.msk.bf16.vlgmr.msrb.gmra.mxu2 %vm827_vm9, %v810_v8 }
 0x2a6   : > { %v965_v28 = vpop.f32.mrf.mxu0 }
 0x2a7   : > { %v995_v29 = vsel %vm2419_vm11, -1e+30, %v965_v28 }
 0x2a8   : > { %v997_v30 = vsel %vm827_vm9, %v995_v29, -inf }
 0x2a9   : > { %998 = vmax.xlane.f32.xlu2 %v997_v30 }
 0x2ae   : > { %v967_v31 = vpop.f32.mrf.mxu0 }
 0x2b6   : > { %v991_v32 = vpop.f32.mrf.mxu1 }
 0x2b7   : > { %v996_v42 = vsel %vm2419_vm11, -1e+30, %v991_v32 }
 0x2b8   : > { %v1000_v43 = vsel %vm827_vm9, %v996_v42, -inf }
 0x2be   : > { %v993_v33 = vpop.f32.mrf.mxu1 }
 0x2c1   : > { %1106 = vrot.lane.b32.xlu2 %v2394_v61, %s2182_s22 }
 0x2c4   : > { %v843_v34 = vpop.f32.mrf.mxu2 }
 0x2c5   : > { %v873_v35 = vsel %vm2419_vm11, -1e+30, %v843_v34 }
 0x2c6   : > { %v875_v36 = vsel %vm827_vm9, %v873_v35, -inf }
 0x2c7   : > { %876 = vmax.xlane.f32.xlu1 %v875_v36 }
 0x2cc   : > { %v845_v37 = vpop.f32.mrf.mxu2 }
 0x2d4   : > { %v867_v38 = vpop.f32.mrf.mxu2 }
 0x2d5   : > { %v874_v39 = vsel %vm2419_vm11, -1e+30, %v867_v38 }
 0x2d6   : > { %v878_v40 = vsel %vm827_vm9, %v874_v39, -inf }
 0x2d7   : > { %879 = vmax.xlane.f32.xlu1 %v878_v40 }
 0x2dc   : > { %v869_v41 = vpop.f32.mrf.mxu2 }
 0x2ea   : > { %1001 = vmax.xlane.f32.xlu2 %v1000_v43 }
 0x2f0   : > { %899 = vrot.lane.b32.xlu1 %v2394_v61, %s2183_s15 }
 0x302   : > { %921 = vrot.lane.b32.xlu2 %v2398_v5, %s2183_s15 }
 0x30a   : > { %1129 = vrot.lane.b32.xlu2 %v2398_v5, %s2182_s22 }
 0x31c   : > { %v999_v44 = vpop.xlane.xlu2 %998 }
 0x31d   : > { %v1003_v45 = vsub.f32 %v995_v29, %v999_v44 }
 0x31f   : > { %v1005_v46 = vmul.f32 1.442695, %v1003_v45 }
 0x321   : > { %2075 = vpow2.f32 %v1005_v46 }
 0x324   : > { %v1107_v47 = vpop.permute.xlu2 %1106 }
 0x325   : > { %v1112_v48 = vsel %vm827_vm9, %v1107_v47, 0 }
 0x326   : > { %1121 = vmatpush.bf16.xpose.msrb.mxu2 %v1112_v48  ;;  %v818_v48 = vld [vmem:[%s2659_s14] sm:$0xf] }
 0x327   : > { %v2076_v49 = vpop.eup %2075 }
 0x328   : > { %v1009_v50 = vsel %vm827_vm9, %v2076_v49, 0.0 }
 0x329   : > { %1010 = vadd.xlane.f32.xlu0 %v1009_v50 }
 0x33a   : > { %v877_v51 = vpop.xlane.xlu1 %876 }
 0x33b   : > { %v881_v56 = vsub.f32 %v873_v35, %v877_v51 }
 0x33d   : > { %1104 = vrot.lane.b32.xlu0 %v2400_v6, %s2184_s19  ;;  %v883_v58 = vmul.f32 1.442695, %v881_v56 }
 0x34a   : > { %v880_v52 = vpop.xlane.xlu1 %879 }
 0x34b   : > { %v882_v53 = vsub.f32 %v874_v39, %v880_v52 }
 0x34d   : > { %v885_v54 = vmul.f32 1.442695, %v882_v53 }
 0x34f   : > { %2077 = vpow2.f32 %v885_v54 }
 0x350   : > { %2079 = vpow2.f32 %v883_v58 }
 0x355   : > { %v2078_v55 = vpop.eup %2077 }
 0x356   : > { %v890_v57 = vsel %vm827_vm9, %v2078_v55, 0.0  ;;  %v2080_v0 = vpop.eup %2079 }
 0x357   : > { %891 = vadd.xlane.f32.xlu1 %v890_v57  ;;  %v887_v7 = vsel %vm827_vm9, %v2080_v0, 0.0 }
 0x35d   : > { %v1002_v59 = vpop.xlane.xlu2 %1001 }
 0x35e   : > { %v1004_v60 = vsub.f32 %v996_v42, %v1002_v59 }
 0x360   : > { %v1007_v62 = vmul.f32 1.442695, %v1004_v60 }
 0x362   : > { %v900_v63 = vpop.permute.xlu1 %899  ;;  %2081 = vpow2.f32 %v1007_v62 }
 0x363   : > { %v906_v1 = vsel %vm904_vm10, %v900_v63, 0 }
 0x364   : > { %915 = vmatpush.bf16.msra.mxu3 %v906_v1 }
 0x365   : > { %v922_v3 = vpop.permute.xlu2 %921 }
 0x366   : > { %v927_v8 = vsel %vm904_vm10, %v922_v3, 0 }
 0x367   : > { %888 = vadd.xlane.f32.xlu0 %v887_v7 }
 0x368   : > { %936 = vmatpush.bf16.msrb.mxu3 %v927_v8  ;;  %v2082_v9 = vpop.eup %2081 }
 0x369   : > { %v1012_v11 = vsel %vm827_vm9, %v2082_v9, 0.0 }
 0x36d   : > { %v1130_v32 = vpop.permute.xlu2 %1129 }
 0x36e   : > { %v1135_v36 = vsel %vm827_vm9, %v1130_v32, 0 }
 0x36f   : > { %1013 = vadd.xlane.f32.xlu0 %v1012_v11 }
 0x370   : > { %1127 = vrot.lane.b32.xlu1 %v2407_v10, %s2184_s19 }
 0x378   : > { %1176 = vrot.lane.b32.xlu1 %v2394_v61, %s2185_s26 }
 0x380   : > { %1243 = vrot.lane.b32.xlu1 %v2394_v61, %s2186_s29 }
 0x383   : > { %1042 = vrot.lane.b32.xlu0 %v2398_v5, %s2181_s20 }
 0x388   : > { %1266 = vrot.lane.b32.xlu1 %v2398_v5, %s2186_s29 }
 0x39c   : > { %v1011_v13 = vpop.xlane.xlu0 %1010 }
 0x39d   : > { %2083 = vrcp.f32 %v1011_v13 }
 0x3a3   : > { %v2084_v14 = vpop.eup %2083 }
 0x3a4   : > { %v1017_v15 = vmul.f32 %v2084_v14, %v2076_v49  ;;  %v1088_v49 = vsel %vm904_vm10, %v818_v48, 0 }
 0x3a5   : > { %1097 = vmatpush.bf16.msrb.mxu1 %v1088_v49 }
 0x3a6   : > { %v1019_v16 = vpack.c.bf16 %v1017_v15, %v1017_v15 }
 0x3a8   : > { %1937 = vmatmul.msk.bf16.vlgmr.msra.gmra.mxu2 %vm827_vm9, %v1019_v16 }
 0x3af   : > { %v1105_v17 = vpop.permute.xlu0 %1104 }
 0x3b8   : > { %1941 = vmatmul.msk.bf16.vlgmr.msrb.gmra.mxu2 %vm827_vm9, %v1105_v17 }
 0x3ca   : > { %v892_v20 = vpop.xlane.xlu1 %891 }
 0x3da   : > { %v889_v21 = vpop.xlane.xlu0 %888 }
 0x3db   : > { %2085 = vrcp.f32 %v889_v21 }
 0x3dc   : > { %2087 = vrcp.f32 %v892_v20 }
 0x3e1   : > { %v2086_v22 = vpop.eup %2085 }
 0x3e2   : > { %v1128_v23 = vpop.permute.xlu1 %1127  ;;  %v895_v24 = vmul.f32 %v2086_v22, %v2080_v0  ;;  %v2088_v29 = vpop.eup %2087 }
 0x3e3   : > { %v1014_v30 = vpop.xlane.xlu0 %1013  ;;  %v896_v31 = vmul.f32 %v2088_v29, %v2078_v55 }
 0x3e4   : > { %v897_v25 = vpack.c.bf16 %v895_v24, %v895_v24  ;;  %2089 = vrcp.f32 %v1014_v30 }
 0x3e5   : > { %v898_v33 = vpack.c.bf16 %v896_v31, %v896_v31 }
 0x3e6   : > { %1933 = vmatmul.msk.bf16.vlgmr.msra.gmra.mxu3 %vm827_vm9, %v897_v25 }
 0x3ea   : > { %v1177_v26 = vpop.permute.xlu1 %1176  ;;  %v2090_v37 = vpop.eup %2089 }
 0x3eb   : > { %v1182_v28 = vsel %vm904_vm10, %v1177_v26, 0  ;;  %v1018_v38 = vmul.f32 %v2090_v37, %v2082_v9 }
 0x3ec   : > { %1191 = vmatpush.bf16.msrb.mxu0 %v1182_v28 }
 0x3ed   : > { %v1020_v40 = vpack.c.bf16 %v1018_v38, %v1018_v38 }
 0x3f2   : > { %v1244_v39 = vpop.permute.xlu1 %1243 }
 0x3f3   : > { %v1249_v41 = vsel %vm827_vm9, %v1244_v39, 0 }
 0x3f5   : > { %v1043_v34 = vpop.permute.xlu0 %1042 }
 0x3f6   : > { %v1048_v35 = vsel %vm904_vm10, %v1043_v34, 0  ;;  %1934 = vmatmul.msk.bf16.vlgmr.msrb.gmra.mxu3 %vm827_vm9, %v898_v33 }
 0x3f7   : > { %1057 = vmatpush.bf16.msra.mxu3 %v1048_v35 }
 0x3fa   : > { %v1267_v55 = vpop.permute.xlu1 %1266 }
 0x3fb   : > { %1144 = vmatpush.bf16.xpose.msrb.mxu3 %v1135_v36  ;;  %v1272_v58 = vsel %vm827_vm9, %v1267_v55, 0 }
 0x406   : > { %1938 = vmatmul.msk.bf16.vlgmr.msra.gmra.mxu3 %vm827_vm9, %v1020_v40 }
 0x407   : > { %1258 = vmatpush.bf16.xpose.msra.mxu3 %v1249_v41 }
 0x416   : > { %1942 = vmatmul.msk.bf16.vlgmr.msrb.gmra.mxu3 %vm827_vm9, %v1128_v23 }
 0x42b   : > { %v1038_v42 = vpop.f32.mrf.mxu2 }
 0x433   : > { %v1040_v43 = vpop.f32.mrf.mxu2 }
 0x43b   : > { %v1123_v44 = vpop.f32.mrf.mxu2 }
 0x43c   : > { %v1150_v45 = vsel %vm2419_vm11, -1e+30, %v1123_v44 }
 0x43d   : > { %v1152_v46 = vsel %vm827_vm9, %v1150_v45, -inf }
 0x43e   : > { %1153 = vmax.xlane.f32.xlu0 %v1152_v46 }
 0x443   : > { %v1125_v47 = vpop.f32.mrf.mxu2 }
 0x444   : > { %v820_v47 = vld [vmem:[%s2659_s14 + $0x8] sm:$0xf] }
 0x445   : > { %v1223_v48 = vsel %vm904_vm10, %v820_v47, 0 }
 0x446   : > { %1232 = vmatpush.bf16.msra.mxu2 %v1223_v48 }
 0x452   : > { %1241 = vrot.lane.b32.xlu0 %v2400_v6, %s2187_s28 }
 0x469   : > { %v917_v50 = vpop.f32.mrf.mxu3 }
 0x471   : > { %v919_v51 = vpop.f32.mrf.mxu3 }
 0x479   : > { %v938_v52 = vpop.f32.mrf.mxu3 }
 0x47a   : > { %v942_v53 = vpack.c.bf16 %v938_v52, %v917_v50 }
 0x47c   : > { %1940 = vmatmul.msk.bf16.vlgmr.msrb.gmra.mxu1 %vm827_vm9, %v942_v53 }
 0x481   : > { %v940_v54 = vpop.f32.mrf.mxu3 }
 0x489   : > { %v1059_v56 = vpop.f32.mrf.mxu3 }
 0x48a   : > { %v1063_v57 = vpack.c.bf16 %v1059_v56, %v1038_v42 }
 0x48c   : > { %1939 = vmatmul.msk.bf16.vlgmr.msra.gmra.mxu0 %vm827_vm9, %v1063_v57 }
 0x48d   : > { %1281 = vmatpush.bf16.xpose.msra.mxu0 %v1272_v58 }
 0x491   : > { %v1061_v6 = vpop.f32.mrf.mxu3 }
 0x499   : > { %v1146_v59 = vpop.f32.mrf.mxu3 }
 0x49a   : > { %v1151_v60 = vsel %vm2419_vm11, -1e+30, %v1146_v59 }
 0x49b   : > { %v1155_v62 = vsel %vm827_vm9, %v1151_v60, -inf }
 0x49c   : > { %1156 = vmax.xlane.f32.xlu1 %v1155_v62 }
 0x4a1   : > { %v1148_v63 = vpop.f32.mrf.mxu3 }
 0x4b1   : > { %v1154_v0 = vpop.xlane.xlu0 %1153 }
 0x4b2   : > { %v1158_v1 = vsub.f32 %v1150_v45, %v1154_v0 }
 0x4b4   : > { %v1160_v3 = vmul.f32 1.442695, %v1158_v1 }
 0x4b6   : > { %2091 = vpow2.f32 %v1160_v3 }
 0x4bc   : > { %v2092_v7 = vpop.eup %2091 }
 0x4bd   : > { %v1164_v8 = vsel %vm827_vm9, %v2092_v7, 0.0 }
 0x4be   : > { %1165 = vadd.xlane.f32.xlu2 %v1164_v8 }
 0x4c4   : > { %v1242_v9 = vpop.permute.xlu0 %1241 }
 0x4c5   : > { %1946 = vmatmul.msk.bf16.vlgmr.msra.gmra.mxu3 %vm827_vm9, %v1242_v9 }
 0x4d6   : > { %1264 = vrot.lane.b32.xlu2 %v2407_v10, %s2187_s28 }
 0x4de   : > { %1197 = vrot.lane.b32.xlu2 %v2398_v5, %s2185_s26 }
 0x4f9   : > { %v1099_v11 = vpop.f32.mrf.mxu1 }
 0x501   : > { %v1101_v49 = vpop.f32.mrf.mxu1 }
 0x509   : > { %v1079_v13 = vpop.f32.mrf.mxu0 }
 0x50a   : > { %v2485_v14 = vadd.f32 %v1099_v11, %v1079_v13 }
 0x50f   : > { %v1157_v15 = vpop.xlane.xlu1 %1156 }
 0x510   : > { %v1159_v16 = vsub.f32 %v1151_v60, %v1157_v15  ;;  %v821_v15 = vld [vmem:[%s2659_s14 + $0xc] sm:$0xf] }
 0x511   : > { %v2495_v35 = vpop.f32.mrf.mxu0 }
 0x512   : > { %v1162_v17 = vmul.f32 1.442695, %v1159_v16 }
 0x514   : > { %2093 = vpow2.f32 %v1162_v17 }
 0x51a   : > { %v2094_v18 = vpop.eup %2093 }
 0x51b   : > { %v1167_v19 = vsel %vm827_vm9, %v2094_v18, 0.0 }
 0x51c   : > { %1168 = vadd.xlane.f32.xlu0 %v1167_v19  ;;  %v2064_v19 = vld [vmem:[%s2660_s25] ss:$0 sm:$0xff] }
 0x531   : > { %v1166_v20 = vpop.xlane.xlu2 %1165 }
 0x532   : > { %2095 = vrcp.f32 %v1166_v20 }
 0x538   : > { %v2096_v21 = vpop.eup %2095 }
 0x539   : > { %v1172_v22 = vmul.f32 %v2096_v21, %v2092_v7  ;;  %v1265_v10 = vpop.permute.xlu2 %1264 }
 0x53b   : > { %v1174_v23 = vpack.c.bf16 %v1172_v22, %v1172_v22 }
 0x53d   : > { %1943 = vmatmul.msk.bf16.vlgmr.msrb.gmra.mxu0 %vm827_vm9, %v1174_v23 }
 0x541   : > { %v1198_v24 = vpop.permute.xlu2 %1197 }
 0x542   : > { %v1203_v25 = vsel %vm904_vm10, %v1198_v24, 0 }
 0x543   : > { %1212 = vmatpush.bf16.msra.mxu1 %v1203_v25 }
 0x548   : > { %v1260_v26 = vpop.f32.mrf.mxu3 }
 0x549   : > { %v1287_v28 = vsel %vm2419_vm11, -1e+30, %v1260_v26 }
 0x54a   : > { %v1289_v29 = vsel %vm827_vm9, %v1287_v28, -inf }
 0x54b   : > { %1290 = vmax.xlane.f32.xlu1 %v1289_v29 }
 0x54d   : > { %1947 = vmatmul.msk.bf16.vlgmr.msra.gmra.mxu0 %vm827_vm9, %v1265_v10  ;;  %v1102_v10 = vadd.f32 %v1101_v49, %v2495_v35 }
 0x550   : > { %v1262_v30 = vpop.f32.mrf.mxu3 }
 0x58f   : > { %v1169_v31 = vpop.xlane.xlu0 %1168 }
 0x590   : > { %2097 = vrcp.f32 %v1169_v31 }
 0x596   : > { %v2098_v32 = vpop.eup %2097 }
 0x597   : > { %v1173_v33 = vmul.f32 %v2098_v32, %v2094_v18 }
 0x599   : > { %v1175_v34 = vpack.c.bf16 %v1173_v33, %v1173_v33 }
 0x59b   : > { %1944 = vmatmul.msk.bf16.vlgmr.msra.gmra.mxu1 %vm827_vm9, %v1175_v34 }
 0x5ba   : > { %v1193_v36 = vpop.f32.mrf.mxu0 }
 0x5be   : > { %v1291_v37 = vpop.xlane.xlu1 %1290 }
 0x5bf   : > { %v1295_v38 = vsub.f32 %v1287_v28, %v1291_v37 }
 0x5c1   : > { %v1297_v39 = vmul.f32 1.442695, %v1295_v38 }
 0x5c2   : > { %v1195_v40 = vpop.f32.mrf.mxu0 }
 0x5c3   : > { %2099 = vpow2.f32 %v1297_v39  ;;  %v2007_v40 = vld [vmem:[%s2335_s3 + $0x8] sm:$0xff] }
 0x5c4   : > { %1472 = vmatpush.bf16.msrb.mxu0 %v2007_v40 }
 0x5c9   : > { %v2100_v41 = vpop.eup %2099 }
 0x5ca   : > { %v1283_v42 = vpop.f32.mrf.mxu0  ;;  %v1301_v43 = vsel %vm827_vm9, %v2100_v41, 0.0 }
 0x5cb   : > { %v1288_v44 = vsel %vm2419_vm11, -1e+30, %v1283_v42  ;;  %1302 = vadd.xlane.f32.xlu0 %v1301_v43 }
 0x5cc   : > { %v1292_v45 = vsel %vm827_vm9, %v1288_v44, -inf }
 0x5cd   : > { %1293 = vmax.xlane.f32.xlu2 %v1292_v45 }
 0x5d2   : > { %v1285_v46 = vpop.f32.mrf.mxu0 }
 0x5df   : > { %1313 = vrot.lane.b32.xlu0 %v2394_v61, %s2188_s17 }
 0x618   : > { %v1214_v50 = vpop.f32.mrf.mxu1 }
 0x619   : > { %v1218_v51 = vpack.c.bf16 %v1214_v50, %v1193_v36 }
 0x61b   : > { %1945 = vmatmul.msk.bf16.vlgmr.msra.gmra.mxu2 %vm827_vm9, %v1218_v51 }
 0x620   : > { %v1216_v52 = vpop.f32.mrf.mxu1 }
 0x63e   : > { %v1303_v55 = vpop.xlane.xlu0 %1302 }
 0x640   : > { %v1294_v27 = vpop.xlane.xlu2 %1293 }
 0x641   : > { %v1296_v53 = vsub.f32 %v1288_v44, %v1294_v27  ;;  %v2006_v44 = vld [vmem:[%s2335_s3] sm:$0xff] }
 0x642   : > { %1473 = vmatpush.bf16.msrb.mxu0 %v2006_v44 }
 0x643   : > { %v1299_v54 = vmul.f32 1.442695, %v1296_v53 }
 0x645   : > { %2101 = vpow2.f32 %v1299_v54 }
 0x646   : > { %2103 = vrcp.f32 %v1303_v55 }
 0x64b   : > { %v2102_v56 = vpop.eup %2101 }
 0x64c   : > { %v1304_v57 = vsel %vm827_vm9, %v2102_v56, 0.0  ;;  %v2104_v61 = vpop.eup %2103 }
 0x64d   : > { %1305 = vadd.xlane.f32.xlu1 %v1304_v57  ;;  %v1309_v58 = vmul.f32 %v2104_v61, %v2100_v41 }
 0x64f   : > { %v1311_v60 = vpack.c.bf16 %v1309_v58, %v1309_v58  ;;  %v2065_v58 = vld [vmem:[%s672_s13] ss:$0 sm:$0xff] }
 0x651   : > { %v1314_v6 = vpop.permute.xlu0 %1313 }
 0x652   : > { %v1319_v59 = vsel %vm904_vm10, %v1314_v6, 0 }
 0x653   : > { %1328 = vmatpush.bf16.msrb.mxu1 %v1319_v59 }
 0x656   : > { %1948 = vmatmul.msk.bf16.vlgmr.msrb.gmra.mxu1 %vm827_vm9, %v1311_v60 }
 0x666   : > { %1334 = vrot.lane.b32.xlu1 %v2398_v5, %s2188_s17  ;;  %v1360_v5 = vsel %vm904_vm10, %v821_v15, 0  ;;  %v2015_v15 = vld [vmem:[%s2345_s27 + $0x38] sm:$0xff] }
 0x667   : > { %1369 = vmatpush.bf16.msrb.mxu3 %v1360_v5  ;;  %1637 = vmatpush.bf16.msra.mxu1 %v2015_v15 }
 0x69e   : > { %v1234_v62 = vpop.f32.mrf.mxu2 }
 0x69f   : > { %v1239_v63 = vadd.f32 %v1234_v62, %v2485_v14  ;;  %v2066_v62 = vld [vmem:[%s675_s21] ss:$0 sm:$0xff] }
 0x6a6   : > { %v1236_v16 = vpop.f32.mrf.mxu2 }
 0x6a7   : > { %v1240_v24 = vadd.f32 %v1236_v16, %v1102_v10 }
 0x6c0   : > { %v1306_v0 = vpop.xlane.xlu1 %1305 }
 0x6c1   : > { %2105 = vrcp.f32 %v1306_v0 }
 0x6c7   : > { %v2106_v3 = vpop.eup %2105 }
 0x6c8   : > { %v1310_v7 = vmul.f32 %v2106_v3, %v2102_v56 }
 0x6ca   : > { %v1312_v11 = vpack.c.bf16 %v1310_v7, %v1310_v7 }
 0x6d3   : > { %v1330_v1 = vpop.f32.mrf.mxu1 }
 0x6d8   : > { %v1335_v8 = vpop.permute.xlu1 %1334 }
 0x6d9   : > { %v1340_v9 = vsel %vm904_vm10, %v1335_v8, 0 }
 0x6da   : > { %1349 = vmatpush.bf16.msrb.mxu2 %v1340_v9  ;;  %v2067_v9 = vld [vmem:[%s683_s5] ss:$0 sm:$0xff] }
 0x6db   : > { %v1332_v13 = vpop.f32.mrf.mxu1 }
 0x6dd   : > { %1949 = vmatmul.msk.bf16.vlgmr.msrb.gmra.mxu2 %vm827_vm9, %v1312_v11 }
 0x760   : > { %v1351_v14 = vpop.f32.mrf.mxu2 }
 0x761   : > { %v1355_v17 = vpack.c.bf16 %v1351_v14, %v1330_v1  ;;  %v2014_v14 = vld [vmem:[%s2345_s27 + $0x30] sm:$0xff] }
 0x762   : > { %1638 = vmatpush.bf16.msra.mxu1 %v2014_v14 }
 0x763   : > { %1950 = vmatmul.msk.bf16.vlgmr.msrb.gmra.mxu3 %vm827_vm9, %v1355_v17 }
 0x768   : > { %v1353_v18 = vpop.f32.mrf.mxu2 }
 0x7e6   : > { %v1371_v20 = vpop.f32.mrf.mxu3 }
 0x7e7   : > { %v1376_v21 = vadd.f32 %v1371_v20, %v1239_v63 }
 0x7e9   : > { %v1382_v22 = vadd.f32 %v2064_v19, %v1376_v21 }
 0x7eb   : > { %v2522_v23 = vadd.f32 %v1382_v22, %v2358_v2  ;;  %v2013_v22 = vld [vmem:[%s2345_s27 + $0x28] sm:$0xff] }
 0x7ec   : > { %1639 = vmatpush.bf16.msra.mxu1 %v2013_v22 }
 0x7ed   : > { %v1388_v25 = vsel %vm707_vm1, %v2522_v23, 0.0 }
 0x7ee   : > { %1389 = vadd.xlane.f32.xlu2 %v1388_v25  ;;  %v1373_v26 = vpop.f32.mrf.mxu3 }
 0x7ef   : > { %v1377_v28 = vadd.f32 %v1373_v26, %v1240_v24 }
 0x7f1   : > { %v1383_v29 = vadd.f32 %v2064_v19, %v1377_v28  ;;  %v2012_v28 = vld [vmem:[%s2345_s27 + $0x20] sm:$0xff] }
 0x7f2   : > { %1640 = vmatpush.bf16.msra.mxu1 %v2012_v28 }
 0x7f3   : > { %v2527_v30 = vadd.f32 %v1383_v29, %v2362_v4 }
 0x7f5   : > { %v1391_v31 = vsel %vm707_vm1, %v2527_v30, 0.0 }
 0x7f6   : > { %1392 = vadd.xlane.f32.xlu2 %v1391_v31 }
 0x861   : > { %v1390_v32 = vpop.xlane.xlu2 %1389 }
 0x862   : > { %v1394_v2 = vmul.f32 %v1390_v32, %v2366_v12 }
 0x864   : > { %v1396_v33 = vsub.f32 %v2522_v23, %v1394_v2 }
 0x866   : > { %v1398_v34 = vmul.f32 %v1396_v33, %v1396_v33 }
 0x868   : > { %v1400_v35 = vsel %vm707_vm1, %v1398_v34, 0.0  ;;  %v2011_v34 = vld [vmem:[%s2345_s27 + $0x18] sm:$0xff] }
 0x869   : > { %1401 = vadd.xlane.f32.xlu1 %v1400_v35  ;;  %v1393_v36 = vpop.xlane.xlu2 %1392  ;;  %1641 = vmatpush.bf16.msra.mxu1 %v2011_v34 }
 0x86a   : > { %v1395_v37 = vmul.f32 %v1393_v36, %v2366_v12 }
 0x86c   : > { %v1397_v4 = vsub.f32 %v2527_v30, %v1395_v37 }
 0x86e   : > { %v1399_v38 = vmul.f32 %v1397_v4, %v1397_v4 }
 0x870   : > { %v1403_v39 = vsel %vm707_vm1, %v1399_v38, 0.0 }
 0x871   : > { %1404 = vadd.xlane.f32.xlu0 %v1403_v39 }
 0x8dc   : > { %v1402_v41 = vpop.xlane.xlu1 %1401 }
 0x8dd   : > { %v1406_v42 = vmul.f32 %v1402_v41, %v2366_v12  ;;  %v2010_v41 = vld [vmem:[%s2345_s27 + $0x10] sm:$0xff] }
 0x8de   : > { %1642 = vmatpush.bf16.msra.mxu1 %v2010_v41 }
 0x8df   : > { %v1408_v43 = vadd.f32 1e-05, %v1406_v42 }
 0x8e1   : > { %2107 = vrsqrt.f32 %v1408_v43  ;;  %vm1416_vm13 = vweird.f32 %v1408_v43 }
 0x8e4   : > { %v1405_v45 = vpop.xlane.xlu0 %1404 }
 0x8e5   : > { %v1407_v46 = vmul.f32 %v1405_v45, %v2366_v12 }
 0x8e7   : > { %v2108_v47 = vpop.eup %2107  ;;  %v1409_v48 = vadd.f32 1e-05, %v1407_v46 }
 0x8e8   : > { %v1411_v49 = vmul.f32 %v2108_v47, %v1408_v43  ;;  %vm1417_vm12 = vweird.f32 %v2108_v47 }
 0x8e9   : > { %2109 = vrsqrt.f32 %v1409_v48  ;;  %vm1418_vm14 = vmor %vm1416_vm13, %vm1417_vm12  ;;  %vm1426_vm0 = vweird.f32 %v1409_v48 }
 0x8ea   : > { %v1412_v50 = vmul.f32 %v2108_v47, %v1411_v49  ;;  %v2009_v49 = vld [vmem:[%s2345_s27 + $0x8] sm:$0xff] }
 0x8eb   : > { %1643 = vmatpush.bf16.msra.mxu1 %v2009_v49 }
 0x8ec   : > { %v1413_v51 = vmul.f32 0.5, %v1412_v50 }
 0x8ee   : > { %v1414_v52 = vsub.f32 1.5, %v1413_v51 }
 0x8ef   : > { %v2110_v27 = vpop.eup %2109 }
 0x8f0   : > { %v1415_v53 = vmul.f32 %v2108_v47, %v1414_v52  ;;  %v1421_v54 = vmul.f32 %v2110_v27, %v1409_v48  ;;  %vm1427_vm15 = vweird.f32 %v2110_v27 }
 0x8f1   : > { %vm1428_vm2 = vmor %vm1426_vm0, %vm1427_vm15 }
 0x8f2   : > { %v1422_v55 = vmul.f32 %v2110_v27, %v1421_v54  ;;  %v1419_v56 = vsel %vm1418_vm14, %v2108_v47, %v1415_v53  ;;  %v2008_v54 = vld [vmem:[%s2345_s27] sm:$0xff] }
 0x8f3   : > { %v1430_v6 = vmul.f32 %v1419_v56, %v1396_v33  ;;  %1644 = vmatpush.bf16.msra.mxu1 %v2008_v54 }
 0x8f4   : > { %v1423_v57 = vmul.f32 0.5, %v1422_v55 }
 0x8f5   : > { %v1435_v63 = vmul.f32 %v2065_v58, %v1430_v6 }
 0x8f6   : > { %v1424_v61 = vsub.f32 1.5, %v1423_v57 }
 0x8f7   : > { %v1440_v3 = vadd.f32 %v2066_v62, %v1435_v63 }
 0x8f8   : > { %v1425_v59 = vmul.f32 %v2110_v27, %v1424_v61 }
 0x8fa   : > { %v1429_v60 = vsel %vm1428_vm2, %v2110_v27, %v1425_v59 }
 0x8fb   : > { %v1431_v0 = vmul.f32 %v1429_v60, %v1397_v4 }
 0x8fd   : > { %v1436_v1 = vmul.f32 %v2065_v58, %v1431_v0 }
 0x8ff   : > { %v1441_v7 = vadd.f32 %v2066_v62, %v1436_v1 }
 0x901   : > { %v1442_v8 = vpack.c.bf16 %v1441_v7, %v1440_v3 }
 0x903   : > { %1959 = vmatmul.msk.bf16.vlgmr.msrb.gmra.mxu0 %vm707_vm1, %v1442_v8 }
 0x980   : > { %v1475_v11 = vpop.f32.mrf.mxu0 }
 0x981   : > { %v2557_v13 = vadd.f32 %v2067_v9, %v1475_v11 }
 0x983   : > { %v2561_v5 = vmul.f32 0.70710677, %v2557_v13 }
 0x985   : > { %v1484_v16 = vmul.f32 %v2561_v5, %v2561_v5 }
 0x987   : > { %v1485_v17 = vmin.f32 %v1484_v16, 16.0 }
 0x988   : > { %v1477_v18 = vpop.f32.mrf.mxu0 }
 0x989   : > { %v1486_v19 = vmul.f32 2.1237322e-06, %v1485_v17  ;;  %v1497_v20 = vmul.f32 3.8918573e-05, %v1485_v17  ;;  %v2566_v21 = vadd.f32 %v2067_v9, %v1477_v18 }
 0x98b   : > { %v1487_v10 = vadd.f32 0.00028619796, %v1486_v19  ;;  %v1498_v24 = vadd.f32 0.001143296, %v1497_v20  ;;  %v2570_v25 = vmul.f32 0.70710677, %v2566_v21 }
 0x98d   : > { %v1499_v26 = vmul.f32 %v1498_v24, %v1485_v17  ;;  %v1524_v29 = vmul.f32 %v2570_v25, %v2570_v25  ;;  %v1488_v31 = vmul.f32 %v1487_v10, %v1485_v17 }
 0x98f   : > { %v1500_v32 = vadd.f32 0.014752088, %v1499_v26  ;;  %v1525_v2 = vmin.f32 %v1524_v29, 16.0  ;;  %v1489_v37 = vadd.f32 0.0036580483, %v1488_v31 }
 0x991   : > { %v1501_v33 = vmul.f32 %v1500_v32, %v1485_v17  ;;  %v1526_v35 = vmul.f32 2.1237322e-06, %v1525_v2  ;;  %v1537_v36 = vmul.f32 3.8918573e-05, %v1525_v2  ;;  %v1490_v44 = vmul.f32 %v1489_v37, %v1485_v17 }
 0x993   : > { %v1502_v4 = vadd.f32 0.112945676, %v1501_v33  ;;  %v1527_v38 = vadd.f32 0.00028619796, %v1526_v35  ;;  %v1538_v39 = vadd.f32 0.001143296, %v1537_v36 }
 0x994   : > { %v1491_v51 = vadd.f32 0.05243302, %v1490_v44 }
 0x995   : > { %v1503_v40 = vmul.f32 %v1502_v4, %v1485_v17  ;;  %v1528_v42 = vmul.f32 %v1527_v38, %v1525_v2  ;;  %v1539_v43 = vmul.f32 %v1538_v39, %v1525_v2  ;;  %v1480_v38 = vmul.f32 0.5, %v2557_v13 }
 0x996   : > { %v1492_v56 = vmul.f32 %v1491_v51, %v1485_v17  ;;  %v1481_v39 = vmul.f32 0.5, %v2566_v21 }
 0x997   : > { %v1504_v45 = vadd.f32 0.4994258, %v1503_v40  ;;  %v1529_v46 = vadd.f32 0.0036580483, %v1528_v42  ;;  %v1540_v47 = vadd.f32 0.014752088, %v1539_v43 }
 0x998   : > { %v1493_v59 = vadd.f32 0.18741608, %v1492_v56 }
 0x999   : > { %v1505_v48 = vmul.f32 %v1504_v45, %v1485_v17  ;;  %v1541_v50 = vmul.f32 %v1540_v47, %v1525_v2  ;;  %v1530_v27 = vmul.f32 %v1529_v46, %v1525_v2 }
 0x99a   : > { %v1494_v1 = vmul.f32 %v1493_v59, %v1485_v17 }
 0x99b   : > { %v1506_v52 = vadd.f32 1.0, %v1505_v48  ;;  %v1542_v53 = vadd.f32 0.112945676, %v1541_v50  ;;  %v1531_v57 = vadd.f32 0.05243302, %v1530_v27 }
 0x99c   : > { %v1495_v15 = vadd.f32 1.1283791, %v1494_v1 }
 0x99d   : > { %2111 = vrcp.f32 %v1506_v52  ;;  %v1543_v55 = vmul.f32 %v1542_v53, %v1525_v2  ;;  %v1532_v62 = vmul.f32 %v1531_v57, %v1525_v2  ;;  %v1518_v7 = vand.u32 2147483648, %v1506_v52 }
 0x99e   : > { %v1516_v9 = vand.u32 2147483647, %v1506_v52  ;;  %vm1512_vm4 = vweird.f32 %v1506_v52  ;;  %v1496_v10 = vmul.f32 %v1495_v15, %v2561_v5 }
 0x99f   : > { %v1544_v61 = vadd.f32 0.4994258, %v1543_v55  ;;  %v1533_v8 = vadd.f32 0.18741608, %v1532_v62  ;;  %v1519_v18 = vor.u32 1.1754944e-38, %v1518_v7 }
 0x9a0   : > { %vm1517_vm6 = vcmp.eq.f32.partialorder %v1516_v9, 8.507059e+37 }
 0x9a1   : > { %v1545_v58 = vmul.f32 %v1544_v61, %v1525_v2  ;;  %v1534_v19 = vmul.f32 %v1533_v8, %v1525_v2 }
 0x9a3   : > { %v2112_v6 = vpop.eup %2111  ;;  %v1546_v63 = vadd.f32 1.0, %v1545_v58  ;;  %v1535_v17 = vadd.f32 1.1283791, %v1534_v19 }
 0x9a4   : > { %v1508_v60 = vmul.f32 %v2112_v6, %v1506_v52  ;;  %vm1513_vm3 = vweird.f32 %v2112_v6 }
 0x9a5   : > { %2113 = vrcp.f32 %v1546_v63  ;;  %vm1514_vm5 = vmor %vm1512_vm4, %vm1513_vm3  ;;  %v1558_v26 = vand.u32 2147483648, %v1546_v63  ;;  %v1556_v31 = vand.u32 2147483647, %v1546_v63  ;;  %vm1552_vm8 = vweird.f32 %v1546_v63 }
 0x9a6   : > { %v1509_v0 = vsub.f32 1.0, %v1508_v60  ;;  %v1536_v2 = vmul.f32 %v1535_v17, %v2570_v25  ;;  %v2068_v25 = vld [vmem:[%s691_s16] ss:$0 sm:$0xff] }
 0x9a7   : > { %v1559_v33 = vor.u32 1.1754944e-38, %v1558_v26  ;;  %vm1557_vm10 = vcmp.eq.f32.partialorder %v1556_v31, 8.507059e+37 }
 0x9a8   : > { %v1510_v3 = vmul.f32 %v2112_v6, %v1509_v0 }
 0x9aa   : > { %v1511_v11 = vadd.f32 %v2112_v6, %v1510_v3 }
 0x9ab   : > { %v2114_v16 = vpop.eup %2113 }
 0x9ac   : > { %v1515_v14 = vsel %vm1514_vm5, %v2112_v6, %v1511_v11  ;;  %v1548_v20 = vmul.f32 %v2114_v16, %v1546_v63  ;;  %vm1553_vm7 = vweird.f32 %v2114_v16 }
 0x9ad   : > { %v1520_v22 = vsel %vm1517_vm6, %v1519_v18, %v1515_v14  ;;  %vm1554_vm9 = vmor %vm1552_vm8, %vm1553_vm7 }
 0x9ae   : > { %v1549_v24 = vsub.f32 1.0, %v1548_v20  ;;  %v1521_v28 = vmul.f32 %v1520_v22, %v1496_v10 }
 0x9b0   : > { %v1550_v29 = vmul.f32 %v2114_v16, %v1549_v24  ;;  %v1960_v34 = vclamps-f32 %v1521_v28, 1.0 }
 0x9b2   : > { %v1551_v32 = vadd.f32 %v2114_v16, %v1550_v29  ;;  %v1564_v5 = vadd.f32 1.0, %v1960_v34 }
 0x9b4   : > { %v1555_v35 = vsel %vm1554_vm9, %v2114_v16, %v1551_v32  ;;  %v1566_v41 = vmul.f32 %v1564_v5, %v1480_v38 }
 0x9b5   : > { %v1560_v36 = vsel %vm1557_vm10, %v1559_v33, %v1555_v35 }
 0x9b6   : > { %v1561_v37 = vmul.f32 %v1560_v36, %v1536_v2 }
 0x9b8   : > { %v1961_v4 = vclamps-f32 %v1561_v37, 1.0 }
 0x9ba   : > { %v1565_v40 = vadd.f32 1.0, %v1961_v4 }
 0x9bc   : > { %v1567_v42 = vmul.f32 %v1565_v40, %v1481_v39 }
 0x9be   : > { %v1568_v43 = vpack.c.bf16 %v1567_v42, %v1566_v41 }
 0x9c0   : > { %1645 = vmatmul.bf16.vlgmr.msra.gmra.mxu1 %v1568_v43 }
 0xa3d   : > { %v1646_v44 = vpop.f32.mrf.mxu1 }
 0xa3e   : > { %v1647_v45 = vadd.f32 %v2068_v25, %v1646_v44 }
 0xa40   : > { %v1651_v46 = vadd.f32 %v1647_v45, %v2522_v23 }
 0xa44   : > { %1656 = sbr.rel (%p1994_p6) target bundleno = 2635 (0xa4b), region = 88 }
 0xa45   : > { %v1648_v47 = vpop.f32.mrf.mxu1 }
 0xa46   : > { %v1649_v48 = vadd.f32 %v2068_v25, %v1648_v47 }
 0xa48   : > { %v1652_v13 = vadd.f32 %v1649_v48, %v2527_v30 }
 0xa49   : > { %1657 = vst.msk [vmem:[#allocation2] sm:$0xff] %vm707_vm1, %v1651_v46 }
 0xa4a   : > { %1658 = vst.msk [vmem:[#allocation2 + $0x8] sm:$0xff] %vm707_vm1, %v1652_v13 }
 0xa4b PF: > { %p1995_p7 = scmp.ne.s32.totalorder %s2167_s18, 1 }
 0xa4c   : > { %s2661_s27 = sld [smem:[#allocation11_spill]] (!%p1995_p7) }
 0xa4d   : > { %1662 = sbr.rel (%p1995_p7) target bundleno = 2919 (0xb67), region = 92  ;;  %s2662_s26 = sld [smem:[#allocation12_spill]] (!%p1995_p7) }
 0xa52   : > { %v1665_v21 = vsel %vm707_vm1, %v1651_v46, 0.0  ;;  %v1668_v23 = vsel %vm707_vm1, %v1652_v13, 0.0  ;;  %v2115_v11 = vld [vmem:[%s2661_s27] ss:$0 sm:$0xff] }
 0xa53   : > { %1666 = vadd.xlane.f32.xlu0 %v1665_v21  ;;  %v2116_v14 = vld [vmem:[%s2662_s26] ss:$0 sm:$0xff] }
 0xa5b   : > { %1669 = vadd.xlane.f32.xlu0 %v1668_v23 }
 0xac6   : > { %v1667_v49 = vpop.xlane.xlu0 %1666 }
 0xac7   : > { %v1671_v30 = vmul.f32 %v1667_v49, %v2366_v12 }
 0xac9   : > { %v1673_v50 = vsub.f32 %v1651_v46, %v1671_v30 }
 0xacb   : > { %v1675_v51 = vmul.f32 %v1673_v50, %v1673_v50 }
 0xacd   : > { %v1677_v52 = vsel %vm707_vm1, %v1675_v51, 0.0 }
 0xace   : > { %1678 = vadd.xlane.f32.xlu1 %v1677_v52  ;;  %v1670_v27 = vpop.xlane.xlu0 %1669 }
 0xacf   : > { %v1672_v53 = vmul.f32 %v1670_v27, %v2366_v12 }
 0xad1   : > { %v1674_v54 = vsub.f32 %v1652_v13, %v1672_v53 }
 0xad3   : > { %v1676_v55 = vmul.f32 %v1674_v54, %v1674_v54 }
 0xad5   : > { %v1680_v56 = vsel %vm707_vm1, %v1676_v55, 0.0 }
 0xad6   : > { %1681 = vadd.xlane.f32.xlu1 %v1680_v56 }
 0xb41   : > { %v1679_v57 = vpop.xlane.xlu1 %1678 }
 0xb42   : > { %v1683_v61 = vmul.f32 %v1679_v57, %v2366_v12 }
 0xb44   : > { %v1685_v58 = vadd.f32 1e-05, %v1683_v61 }
 0xb46   : > { %2117 = vrsqrt.f32 %v1685_v58  ;;  %vm1693_vm12 = vweird.f32 %v1685_v58 }
 0xb49   : > { %v1682_v6 = vpop.xlane.xlu1 %1681 }
 0xb4a   : > { %v1684_v59 = vmul.f32 %v1682_v6, %v2366_v12 }
 0xb4c   : > { %v2118_v60 = vpop.eup %2117  ;;  %v1686_v62 = vadd.f32 1e-05, %v1684_v59 }
 0xb4d   : > { %v1688_v63 = vmul.f32 %v2118_v60, %v1685_v58  ;;  %vm1694_vm11 = vweird.f32 %v2118_v60 }
 0xb4e   : > { %2119 = vrsqrt.f32 %v1686_v62  ;;  %vm1695_vm13 = vmor %vm1693_vm12, %vm1694_vm11  ;;  %vm1703_vm15 = vweird.f32 %v1686_v62 }
 0xb4f   : > { %v1689_v0 = vmul.f32 %v2118_v60, %v1688_v63 }
 0xb51   : > { %v1690_v1 = vmul.f32 0.5, %v1689_v0 }
 0xb53   : > { %v1691_v3 = vsub.f32 1.5, %v1690_v1 }
 0xb54   : > { %v2120_v7 = vpop.eup %2119 }
 0xb55   : > { %v1692_v8 = vmul.f32 %v2118_v60, %v1691_v3  ;;  %v1698_v9 = vmul.f32 %v2120_v7, %v1686_v62  ;;  %vm1704_vm14 = vweird.f32 %v2120_v7 }
 0xb56   : > { %vm1705_vm0 = vmor %vm1703_vm15, %vm1704_vm14 }
 0xb57   : > { %v1696_v15 = vsel %vm1695_vm13, %v2118_v60, %v1692_v8  ;;  %v1699_v16 = vmul.f32 %v2120_v7, %v1698_v9 }
 0xb58   : > { %v1707_v12 = vmul.f32 %v1696_v15, %v1673_v50 }
 0xb59   : > { %v1700_v18 = vmul.f32 0.5, %v1699_v16 }
 0xb5a   : > { %v1712_v19 = vmul.f32 %v2115_v11, %v1707_v12 }
 0xb5b   : > { %v1701_v20 = vsub.f32 1.5, %v1700_v18 }
 0xb5c   : > { %v1717_v22 = vadd.f32 %v2116_v14, %v1712_v19 }
 0xb5d   : > { %v1702_v10 = vmul.f32 %v2120_v7, %v1701_v20 }
 0xb5e   : > { %1719 = vst.msk [vmem:[#allocation2] sm:$0xff] %vm707_vm1, %v1717_v22 }
 0xb5f   : > { %v1706_v24 = vsel %vm1705_vm0, %v2120_v7, %v1702_v10 }
 0xb60   : > { %v1708_v17 = vmul.f32 %v1706_v24, %v1674_v54 }
 0xb62   : > { %v1713_v26 = vmul.f32 %v2115_v11, %v1708_v17 }
 0xb64   : > { %v1718_v28 = vadd.f32 %v2116_v14, %v1713_v26 }
 0xb66   : > { %1720 = vst.msk [vmem:[#allocation2 + $0x8] sm:$0xff] %vm707_vm1, %v1718_v28 }
 0xb67 PF: > { %s2663_s29 = sld [smem:[#allocation6_spill]]  ;;  %s2189_s3 = smov [#allocation2]  }
 0xb68   : > { %s2665_s24 = sld [smem:[#allocation13_spill]]  ;;  %s1729_s20 = sshll.u32 %s2189_s3, 4  ;;  %s1730_s20 = int_to_ptr.vmem [resolvable:$true] %s1729_s20 }
 0xb69   : > { %s2190_s22 = smov 128   ;;  %s2191_s15 = smov 8  }
 0xb6d   : > { %s2664_s28 = sadd.s32 4294967295, %s2663_s29  }
 0xb6e   : > { %p2020_p8 = scmp.eq.s32.totalorder %s2664_s28, 1  ;;  %s1731_s25 = sshll.u32 %s2665_s24, 4  ;;  %s1732_s25 = int_to_ptr.hbm [resolvable:$true] %s1731_s25 }
 0xb70   : > { %2017 = dma.vmem_to_hbm [thread:$0]  (%p2020_p8), %s1730_s20, 256, %s1732_s25, [#allocation3], %s2190_s22, %s2190_s22, %s2191_s15  }
 0xb71   : > { %2162 = dma.done.wait (%p2020_p8), [#allocation3], 256  }
 0xb72   : > { %2164 = vsyncadd (%p2020_p8), [#allocation3], 4294967040 }
 0xb73 PF: > { %s2666_s13 = sld [smem:[#allocation6_spill]] }
 0xb74   : > { %s2667_s18 = sld [smem:[#allocation5_spill]] }
 0xb75   : > { %s2668_s19 = sld [smem:[#allocation7_spill]] }
 0xb79   : > { %s26_s20 = sadd.s32 1, %s2666_s13  }
 0xb7a   : > { %p23_p9 = scmp.ge.s32.totalorder %s26_s20, 4  }
 0xb7c   :  { %25 = sbr.rel (!%p23_p9) target bundleno = 8 (0x8), region = 156 }
 0xb81   :  { %1748 = vsyncpa [#allocation3], 1 }
 0xb82   :  { %1750 = vsyncpa [#allocation3 + $0x1], 1 }

</bundles_post_ra>
